<compile_context>
chip_gen: v7x
topology: tpu7x:2x2x1
jax: 0.10.0
libtpu: 0.0.40
codegen_flags: <defaults>
</compile_context>

<pallas_src>
import functools
import math

import numpy as np
import jax
import jax.numpy as jnp
from jax.experimental import pallas as pl
from jax.experimental.pallas import tpu as pltpu


# -----------------------------------------------------------------------------
# Kernel 1: norm1 -> bias-free multi-head self-attention -> +shortcut -> norm2
# -----------------------------------------------------------------------------
def _attn_block_kernel(x_ref, g1_ref, b1_ref, wqkv_ref, wo_ref, g2_ref, b2_ref,
                       mask_ref, o_ref, *, num_heads, head_dim, eps):
    xs = x_ref[...]                                 # (R, E) f32, R = TB*L (batch-folded rows)
    E = xs.shape[-1]
    wdt = wqkv_ref.dtype                            # matmul operand dtype (f32 or bf16)
    approx = wdt != jnp.float32                     # EUP approx reciprocal only in perf config

    # LayerNorm1 (PyTorch eps=1e-5, affine), f32
    mu = jnp.mean(xs, axis=-1, keepdims=True)
    xc = xs - mu
    var = jnp.mean(xc * xc, axis=-1, keepdims=True)
    xn = xc * jax.lax.rsqrt(var + eps) * g1_ref[...] + b1_ref[...]

    # Fused QKV projection: one (R, E) @ (E, 3E) MXU matmul, f32 accumulation.
    # The 1/sqrt(head_dim) softmax scale is pre-folded into the q-columns host-side.
    qkv = jnp.dot(xn.astype(wdt), wqkv_ref[...],
                  preferred_element_type=jnp.float32)              # (R, 3E)

    add_mask = mask_ref[...]                        # (R, R): 0 same-batch, -1e30 cross-batch

    # Per-head attention over the batch-folded rows; the additive block-diagonal mask
    # keeps batches independent.  Heads are concatenated along lanes so the output
    # projection is a single dense (R, E) @ (E, E) matmul.
    ctx_heads = []
    for h in range(num_heads):                      # static unroll (4 iters)
        lo = h * head_dim
        qh = qkv[:, lo:lo + head_dim]               # (R, D), already scaled
        kh = qkv[:, E + lo:E + lo + head_dim]       # (R, D)
        vh = qkv[:, 2 * E + lo:2 * E + lo + head_dim]
        s = jax.lax.dot_general(qh.astype(wdt), kh.astype(wdt),
                                (((1,), (1,)), ((), ())),
                                preferred_element_type=jnp.float32)  # (R, R)
        s = s + add_mask
        s = s - jnp.max(s, axis=-1, keepdims=True)
        pr = jnp.exp(s)
        denom = jnp.sum(pr, axis=-1, keepdims=True)
        pr = pr * pl.reciprocal(denom, approx=approx)
        ctx_heads.append(jnp.dot(pr.astype(wdt), vh.astype(wdt),
                                 preferred_element_type=jnp.float32))  # (R, D)
    ctx = jnp.concatenate(ctx_heads, axis=-1)       # (R, E), lane concat
    attn_out = jnp.dot(ctx.astype(wdt), wo_ref[...],
                       preferred_element_type=jnp.float32)           # (R, E)

    # Residual (pre-norm shortcut) + LayerNorm2, fused; lane-dense (E=128) store.
    y = xs + attn_out
    mu2 = jnp.mean(y, axis=-1, keepdims=True)
    yc = y - mu2
    var2 = jnp.mean(yc * yc, axis=-1, keepdims=True)
    o_ref[...] = yc * jax.lax.rsqrt(var2 + eps) * g2_ref[...] + b2_ref[...]


def attn_block(tokens_flat, prep, *, batch, seq, num_heads, batch_tile=None):
    """tokens_flat: (B*L, E) f32; returns (B*L, E) f32."""
    BL, E = tokens_flat.shape
    L = seq
    TB = batch if batch_tile is None else batch_tile     # default: whole batch per step
    assert batch % TB == 0 and BL == batch * L
    R = TB * L
    D = E // num_heads

    # Static additive block-diagonal mask (host-side constant, 0 / -1e30).
    add_mask = jnp.asarray(
        np.where(np.kron(np.eye(TB), np.ones((L, L))) > 0.5, 0.0, -1e30)
        .astype(np.float32))

    kernel = functools.partial(_attn_block_kernel, num_heads=num_heads,
                               head_dim=D, eps=1e-5)
    # NOTE: on v7x set batch_tile = batch // 2 to shard the batch across both
    # TensorCores ("parallel" grid); on v5e/v6e the default single step is best.
    return pl.pallas_call(
        kernel,
        out_shape=jax.ShapeDtypeStruct((BL, E), jnp.float32),
        grid=(batch // TB,),
        in_specs=[
            pl.BlockSpec((R, E), lambda b: (b, 0)),          # tokens (batch-folded rows)
            pl.BlockSpec((1, E), lambda b: (0, 0)),          # ln1 gamma
            pl.BlockSpec((1, E), lambda b: (0, 0)),          # ln1 beta
            pl.BlockSpec((E, 3 * E), lambda b: (0, 0)),      # fused qkv weight (scale folded)
            pl.BlockSpec((E, E), lambda b: (0, 0)),          # out-proj weight (transposed)
            pl.BlockSpec((1, E), lambda b: (0, 0)),          # ln2 gamma
            pl.BlockSpec((1, E), lambda b: (0, 0)),          # ln2 beta
            pl.BlockSpec((R, R), lambda b: (0, 0)),          # additive block-diag mask
        ],
        out_specs=pl.BlockSpec((R, E), lambda b: (b, 0)),
        compiler_params=pltpu.CompilerParams(dimension_semantics=("parallel",)),
    )(tokens_flat, prep["g1"], prep["b1"], prep["wqkv"], prep["wo"],
      prep["g2"], prep["b2"], add_mask)


# -----------------------------------------------------------------------------
# Kernel 2: Conv2d(C, C, k, padding=k//2) -> GELU -> +residual
# Conv is computed as K row-band matmuls on batch-folded rows: for kernel row ki,
# the pre-shifted padded NHWC rows (B*H, (W+2p)*C) are multiplied by a block-banded
# weight matrix T[ki] of shape ((W+2p)*C, W*C) built once host-side.  Output rows
# are W*C = 128 wide -> lane-dense stores, and no sublane-unaligned slicing occurs.
# -----------------------------------------------------------------------------
def _conv_gelu_res_kernel(xres_ref, xshift_ref, t_ref, bias_ref, o_ref, *, K):
    wdt = t_ref.dtype
    acc = jnp.zeros(o_ref.shape, jnp.float32)
    for ki in range(K):                                   # static unroll over kernel rows
        acc = acc + jnp.dot(xshift_ref[ki].astype(wdt), t_ref[ki],
                            preferred_element_type=jnp.float32)
    acc = acc + bias_ref[...]
    # TODO(synk): PyTorch nn.GELU default is the exact (erf) form; tanh approximation
    # is used here for Mosaic-safe lowering (max deviation ~1e-3).
    c = 0.7978845608028654   # sqrt(2/pi)
    act = 0.5 * acc * (1.0 + jnp.tanh(c * (acc + 0.044715 * acc * acc * acc)))
    o_ref[...] = xres_ref[...] + act


def conv_gelu_residual(x_rows, prep, *, batch, height, width, channels, kernel_size):
    """x_rows: (B*H, W*C) f32 NHWC rows; returns (B*H, W*C) f32 = x + GELU(conv(x))."""
    B, H, W, C, K = batch, height, width, channels, kernel_size
    pad = K // 2
    Wp2 = W + 2 * pad

    x_img = x_rows.reshape(B, H, W, C)
    x_pad = jnp.pad(x_img, ((0, 0), (pad, pad), (pad, pad), (0, 0)))
    x_pad = x_pad.reshape(B, H + 2 * pad, Wp2 * C)
    # K pre-shifted row bands -> in-kernel access is a leading-axis select (no
    # sublane-unaligned slicing, no in-kernel relayout copies).
    x_shift = jnp.stack([x_pad[:, ki:ki + H, :] for ki in range(K)], axis=0)
    x_shift = x_shift.reshape(K, B * H, Wp2 * C)

    t_mats = prep["t_mats"]
    kernel = functools.partial(_conv_gelu_res_kernel, K=K)
    return pl.pallas_call(
        kernel,
        out_shape=jax.ShapeDtypeStruct((B * H, W * C), jnp.float32),
        grid=(1,),
        in_specs=[
            pl.BlockSpec((B * H, W * C), lambda i: (0, 0)),          # residual rows
            pl.BlockSpec((K, B * H, Wp2 * C), lambda i: (0, 0, 0)),  # pre-shifted rows
            pl.BlockSpec(tuple(t_mats.shape), lambda i: (0, 0, 0)),  # block-banded weights
            pl.BlockSpec((1, W * C), lambda i: (0, 0)),              # bias row
        ],
        out_specs=pl.BlockSpec((B * H, W * C), lambda i: (0, 0)),
        compiler_params=pltpu.CompilerParams(dimension_semantics=("arbitrary",)),
    )(x_rows, x_shift, t_mats, prep["bias_row"])


# -----------------------------------------------------------------------------
# Host-side (one-time, numpy) parameter preparation -- hoisted out of the forward.
# -----------------------------------------------------------------------------
def _conv_row_matrices_np(w_conv, W, pad):
    """Expand an OIHW conv weight into K block-banded matrices T[ki] of shape
    ((W+2*pad)*Cin, W*Cout): a padded NHWC row times T[ki] gives kernel-row ki's
    contribution to the output row (output lane index = j_out*Cout + co)."""
    Cout, Cin, K, _ = w_conv.shape
    Wp2 = W + 2 * pad
    mats = np.zeros((K, Wp2 * Cin, W * Cout), np.float32)
    for ki in range(K):
        for kj in range(K):
            wk_t = np.ascontiguousarray(w_conv[:, :, ki, kj].T)    # (Cin, Cout)
            for j in range(W):
                r0 = (j + kj) * Cin
                c0 = j * Cout
                mats[ki, r0:r0 + Cin, c0:c0 + Cout] += wk_t
    return mats


def prepare_params(params, *, dim, img_size, patch_dim, num_heads, kernel_size,
                   w_dtype=jnp.bfloat16):
    """Runs ONCE (numpy): folds the softmax scale into the q-columns of the fused QKV
    weight, transposes projections, expands the conv weight into row-band matrices and
    tiles the conv bias.  `w_dtype` selects the MXU operand dtype (bf16 perf / f32 exact)."""
    E = dim * patch_dim * patch_dim
    D = E // num_heads
    pad = kernel_size // 2
    W = img_size

    w_in_t = np.asarray(params["w_in"], np.float32).T.copy()        # (E, 3E): x @ W_in^T
    w_in_t[:, :E] *= 1.0 / math.sqrt(D)                             # fold softmax scale into q
    wo_t = np.asarray(params["w_out"], np.float32).T.copy()         # (E, E):  ctx @ W_out^T
    t_mats = _conv_row_matrices_np(np.asarray(params["w_conv"], np.float32), W, pad)
    bias_row = np.tile(np.asarray(params["b_conv"], np.float32), W).reshape(1, W * dim)

    f32 = lambda a, shape: jnp.asarray(np.asarray(a, np.float32).reshape(shape))
    return {
        "g1": f32(params["ln1_g"], (1, E)), "b1": f32(params["ln1_b"], (1, E)),
        "g2": f32(params["ln2_g"], (1, E)), "b2": f32(params["ln2_b"], (1, E)),
        "wqkv": jnp.asarray(w_in_t, w_dtype),
        "wo": jnp.asarray(wo_t, w_dtype),
        "t_mats": jnp.asarray(t_mats, w_dtype),
        "bias_row": jnp.asarray(bias_row),
    }


# -----------------------------------------------------------------------------
# Layout plumbing (equivalent to unfold/fold/PixelShuffle, pure permutations)
# -----------------------------------------------------------------------------
def space_to_depth_tokens(x, p):
    """Piexl_Shuffle_Invert(p) + Patch_Embed(1): (B,C,H,W) -> (B, L, E),
    l = i*(W/p)+j, e = c*p*p + ki*p + kj (matches F.unfold ordering)."""
    B, C, H, W = x.shape
    Hp, Wp = H // p, W // p
    return (x.reshape(B, C, Hp, p, Wp, p)
             .transpose(0, 2, 4, 1, 3, 5)
             .reshape(B, Hp * Wp, C * p * p))


def depth_to_space_image(tokens, C, H, W, p):
    """Patch_UnEmbed(1) + PixelShuffle(p): (B, L, E) -> (B, C, H, W)."""
    B = tokens.shape[0]
    Hp, Wp = H // p, W // p
    return (tokens.reshape(B, Hp, Wp, C, p, p)
                  .transpose(0, 3, 1, 4, 2, 5)
                  .reshape(B, C, H, W))


def cbformer_forward(x, prep, *, patch_dim, num_heads, kernel_size, batch_tile=None):
    B, C, H, W = x.shape
    p = patch_dim
    Hp, Wp = H // p, W // p
    L, E = Hp * Wp, C * p * p

    tokens = space_to_depth_tokens(x, p).reshape(B * L, E)            # (B*L, E)
    y = attn_block(tokens, prep, batch=B, seq=L, num_heads=num_heads,
                   batch_tile=batch_tile)                             # Pallas kernel 1
    # tokens -> lane-dense NHWC image rows (single XLA transpose; see TODO at top).
    x_rows = (y.reshape(B, Hp, Wp, C, p, p)
                .transpose(0, 1, 4, 2, 5, 3)
                .reshape(B * H, W * C))
    out_rows = conv_gelu_residual(x_rows, prep, batch=B, height=H, width=W,
                                  channels=C, kernel_size=kernel_size)  # Pallas kernel 2
    return out_rows.reshape(B, H, W, C).transpose(0, 3, 1, 2)           # back to NCHW


# -----------------------------------------------------------------------------
# Parameters (PyTorch layouts) and a pure-JAX reference of the module forward
# -----------------------------------------------------------------------------
def make_params(key, dim, patch_dim, num_heads, kernel_size):
    E = dim * patch_dim * patch_dim
    ks = jax.random.split(key, 8)
    return {
        "ln1_g": 1.0 + 0.1 * jax.random.normal(ks[0], (E,), jnp.float32),
        "ln1_b": 0.1 * jax.random.normal(ks[1], (E,), jnp.float32),
        "ln2_g": 1.0 + 0.1 * jax.random.normal(ks[2], (E,), jnp.float32),
        "ln2_b": 0.1 * jax.random.normal(ks[3], (E,), jnp.float32),
        "w_in": 0.05 * jax.random.normal(ks[4], (3 * E, E), jnp.float32),   # in_proj_weight
        "w_out": 0.05 * jax.random.normal(ks[5], (E, E), jnp.float32),      # out_proj.weight
        # TODO(synk): `conv` helper is not defined in the spec; assumed
        # nn.Conv2d(dim, dim, kernel_size, padding=kernel_size // 2, bias=True).
        "w_conv": 0.05 * jax.random.normal(
            ks[6], (dim, dim, kernel_size, kernel_size), jnp.float32),
        "b_conv": 0.05 * jax.random.normal(ks[7], (dim,), jnp.float32),
    }


def _layer_norm_ref(x, g, b, eps=1e-5):
    mu = x.mean(-1, keepdims=True)
    var = ((x - mu) ** 2).mean(-1, keepdims=True)
    return (x - mu) * jax.lax.rsqrt(var + eps) * g + b


def cbformer_ref(x, params, *, patch_dim, num_heads, kernel_size):
    P_HIGH = jax.lax.Precision.HIGHEST
    B, C, H, W = x.shape
    E = C * patch_dim * patch_dim
    D = E // num_heads
    tokens = space_to_depth_tokens(x, patch_dim)
    shortcut = tokens
    t = _layer_norm_ref(tokens, params["ln1_g"], params["ln1_b"])
    L = t.shape[1]
    qkv = jnp.einsum("ble,fe->blf", t, params["w_in"], precision=P_HIGH)
    q, k, v = qkv[..., :E], qkv[..., E:2 * E], qkv[..., 2 * E:]
    heads = lambda z: z.reshape(B, L, num_heads, D).transpose(0, 2, 1, 3)
    q = heads(q) * (1.0 / math.sqrt(D))
    k = heads(k)
    v = heads(v)
    logits = jnp.einsum("bhld,bhmd->bhlm", q, k, precision=P_HIGH)
    attn = jax.nn.softmax(logits, axis=-1)
    o = jnp.einsum("bhlm,bhmd->bhld", attn, v, precision=P_HIGH)
    o = o.transpose(0, 2, 1, 3).reshape(B, L, E)
    o = jnp.einsum("ble,fe->blf", o, params["w_out"], precision=P_HIGH)
    y = _layer_norm_ref(shortcut + o, params["ln2_g"], params["ln2_b"])
    img = depth_to_space_image(y, C, H, W, patch_dim)
    pad = kernel_size // 2
    conv = jax.lax.conv_general_dilated(
        img, params["w_conv"], window_strides=(1, 1),
        padding=[(pad, pad), (pad, pad)],
        dimension_numbers=("NCHW", "OIHW", "NCHW"), precision=P_HIGH)
    conv = conv + params["b_conv"][None, :, None, None]
    c = 0.7978845608028654
    act = 0.5 * conv * (1.0 + jnp.tanh(c * (conv + 0.044715 * conv ** 3)))
    return img + act


if __name__ == "__main__":
    B = 2
    dim = 8                  # image channels
    img_size = 16
    patch_dim = 4            # embed_dim E = dim*p*p = 128 (lane-dense), L = 16 tokens
    num_heads = 4
    kernel_size = 5

    key = jax.random.PRNGKey(0)
    kx, kp = jax.random.split(key)
    x = jax.random.normal(kx, (B, dim, img_size, img_size), jnp.float32)
    params = make_params(kp, dim, patch_dim, num_heads, kernel_size)

    fwd = jax.jit(functools.partial(cbformer_forward, patch_dim=patch_dim,
                                    num_heads=num_heads, kernel_size=kernel_size))
    ref = cbformer_ref(x, params, patch_dim=patch_dim, num_heads=num_heads,
                       kernel_size=kernel_size)

    # (1) exact-semantics config: f32 MXU operands, strict tolerance.
    prep_f32 = prepare_params(params, dim=dim, img_size=img_size, patch_dim=patch_dim,
                              num_heads=num_heads, kernel_size=kernel_size,
                              w_dtype=jnp.float32)
    out_f32 = jax.block_until_ready(fwd(x, prep_f32))
    assert out_f32.shape == (B, dim, img_size, img_size)
    err_f32 = float(jnp.max(jnp.abs(out_f32 - ref)))
    assert jnp.allclose(out_f32, ref, atol=2e-3, rtol=2e-3), err_f32

    # (2) perf config: bf16 MXU operands with f32 accumulation (per perf review);
    #     relaxed tolerance for the bf16 rounding drift.
    prep_bf16 = prepare_params(params, dim=dim, img_size=img_size, patch_dim=patch_dim,
                               num_heads=num_heads, kernel_size=kernel_size,
                               w_dtype=jnp.bfloat16)
    out_bf16 = jax.block_until_ready(fwd(x, prep_bf16))
    err_bf16 = float(jnp.max(jnp.abs(out_bf16 - ref)))
    assert jnp.allclose(out_bf16, ref, atol=5e-2, rtol=5e-2), err_bf16

    print("KERNEL_OK")
</pallas_src>

<mosaic_0001>
module attributes {stable_mosaic.version = 11 : i64} {
  func.func @_attn_block_kernel(%arg0: i32, %arg1: memref<32x128xf32, #tpu.memory_space<vmem>>, %arg2: memref<1x128xf32, #tpu.memory_space<vmem>>, %arg3: memref<1x128xf32, #tpu.memory_space<vmem>>, %arg4: memref<128x384xf32, #tpu.memory_space<vmem>>, %arg5: memref<128x128xf32, #tpu.memory_space<vmem>>, %arg6: memref<1x128xf32, #tpu.memory_space<vmem>>, %arg7: memref<1x128xf32, #tpu.memory_space<vmem>>, %arg8: memref<32x32xf32, #tpu.memory_space<vmem>>, %arg9: memref<32x128xf32, #tpu.memory_space<vmem>>) attributes {dimension_semantics = [#tpu.dimension_semantics<parallel>], iteration_bounds = array<i64: 1>, scalar_prefetch = 0 : i64, scratch_operands = 0 : i64, tpu.core_type = #tpu.core_type<tc>, window_params = [{transform_indices = @transform_0, window_bounds = array<i64: 32, 128>}, {pipeline_mode = #tpu.pipeline_mode<synchronous>, transform_indices = @transform_1, window_bounds = array<i64: 1, 128>}, {pipeline_mode = #tpu.pipeline_mode<synchronous>, transform_indices = @transform_2, window_bounds = array<i64: 1, 128>}, {pipeline_mode = #tpu.pipeline_mode<synchronous>, transform_indices = @transform_3, window_bounds = array<i64: 128, 384>}, {pipeline_mode = #tpu.pipeline_mode<synchronous>, transform_indices = @transform_4, window_bounds = array<i64: 128, 128>}, {pipeline_mode = #tpu.pipeline_mode<synchronous>, transform_indices = @transform_5, window_bounds = array<i64: 1, 128>}, {pipeline_mode = #tpu.pipeline_mode<synchronous>, transform_indices = @transform_6, window_bounds = array<i64: 1, 128>}, {pipeline_mode = #tpu.pipeline_mode<synchronous>, transform_indices = @transform_7, window_bounds = array<i64: 32, 32>}, {transform_indices = @transform_8, window_bounds = array<i64: 32, 128>}]} {
    %c0 = arith.constant 0 : index
    %c0_0 = arith.constant 0 : index
    %0 = vector.load %arg1[%c0, %c0_0] : memref<32x128xf32, #tpu.memory_space<vmem>>, vector<32x128xf32>
    %cst = arith.constant dense<0.000000e+00> : vector<32xf32>
    %1 = vector.multi_reduction <add>, %0, %cst [1] : vector<32x128xf32> to vector<32xf32>
    %2 = vector.shape_cast %1 : vector<32xf32> to vector<32x1xf32>
    %cst_1 = arith.constant 1.280000e+02 : f32
    %3 = vector.broadcast %cst_1 : f32 to vector<32x1xf32>
    %4 = arith.divf %2, %3 : vector<32x1xf32>
    %5 = vector.broadcast %4 : vector<32x1xf32> to vector<32x128xf32>
    %6 = arith.subf %0, %5 : vector<32x128xf32>
    %7 = arith.mulf %6, %6 : vector<32x128xf32>
    %cst_2 = arith.constant dense<0.000000e+00> : vector<32xf32>
    %8 = vector.multi_reduction <add>, %7, %cst_2 [1] : vector<32x128xf32> to vector<32xf32>
    %9 = vector.shape_cast %8 : vector<32xf32> to vector<32x1xf32>
    %cst_3 = arith.constant 1.280000e+02 : f32
    %10 = vector.broadcast %cst_3 : f32 to vector<32x1xf32>
    %11 = arith.divf %9, %10 : vector<32x1xf32>
    %cst_4 = arith.constant 9.99999974E-6 : f32
    %12 = vector.broadcast %cst_4 : f32 to vector<32x1xf32>
    %13 = arith.addf %11, %12 : vector<32x1xf32>
    %14 = math.rsqrt %13 : vector<32x1xf32>
    %15 = vector.broadcast %14 : vector<32x1xf32> to vector<32x128xf32>
    %16 = arith.mulf %6, %15 : vector<32x128xf32>
    %c0_5 = arith.constant 0 : index
    %c0_6 = arith.constant 0 : index
    %17 = vector.load %arg2[%c0_5, %c0_6] : memref<1x128xf32, #tpu.memory_space<vmem>>, vector<1x128xf32>
    %18 = vector.broadcast %17 : vector<1x128xf32> to vector<32x128xf32>
    %19 = arith.mulf %16, %18 : vector<32x128xf32>
    %c0_7 = arith.constant 0 : index
    %c0_8 = arith.constant 0 : index
    %20 = vector.load %arg3[%c0_7, %c0_8] : memref<1x128xf32, #tpu.memory_space<vmem>>, vector<1x128xf32>
    %21 = vector.broadcast %20 : vector<1x128xf32> to vector<32x128xf32>
    %22 = arith.addf %19, %21 : vector<32x128xf32>
    %c0_9 = arith.constant 0 : index
    %c0_10 = arith.constant 0 : index
    %23 = vector.load %arg4[%c0_9, %c0_10] : memref<128x384xf32, #tpu.memory_space<vmem>>, vector<128x384xf32>
    %cst_11 = arith.constant dense<0.000000e+00> : vector<32x384xf32>
    %24 = tpu.matmul %22, %23, %cst_11 {dimension_numbers = #tpu.dot_dimension_numbers<[1], [0], [0], [1], [0, 0, 1, 1], [], []>} : vector<32x128xf32>, vector<128x384xf32>, vector<32x384xf32> -> vector<32x384xf32>
    %c0_12 = arith.constant 0 : index
    %c0_13 = arith.constant 0 : index
    %25 = vector.load %arg8[%c0_12, %c0_13] : memref<32x32xf32, #tpu.memory_space<vmem>>, vector<32x32xf32>
    %26 = vector.extract_strided_slice %24 {offsets = [0, 0], sizes = [32, 32], strides = [1, 1]} : vector<32x384xf32> to vector<32x32xf32>
    %27 = vector.extract_strided_slice %24 {offsets = [0, 128], sizes = [32, 32], strides = [1, 1]} : vector<32x384xf32> to vector<32x32xf32>
    %28 = vector.extract_strided_slice %24 {offsets = [0, 256], sizes = [32, 32], strides = [1, 1]} : vector<32x384xf32> to vector<32x32xf32>
    %cst_14 = arith.constant dense<0.000000e+00> : vector<32x32xf32>
    %29 = tpu.matmul %26, %27, %cst_14 {dimension_numbers = #tpu.dot_dimension_numbers<[1], [1], [0], [0], [0, 0, 1, 0], [], []>} : vector<32x32xf32>, vector<32x32xf32>, vector<32x32xf32> -> vector<32x32xf32>
    %30 = arith.addf %29, %25 : vector<32x32xf32>
    %cst_15 = arith.constant dense<0xFF800000> : vector<32xf32>
    %31 = vector.multi_reduction <maximumf>, %30, %cst_15 [1] : vector<32x32xf32> to vector<32xf32>
    %32 = vector.shape_cast %31 : vector<32xf32> to vector<32x1xf32>
    %33 = vector.broadcast %32 : vector<32x1xf32> to vector<32x32xf32>
    %34 = arith.subf %30, %33 : vector<32x32xf32>
    %35 = math.exp %34 : vector<32x32xf32>
    %cst_16 = arith.constant dense<0.000000e+00> : vector<32xf32>
    %36 = vector.multi_reduction <add>, %35, %cst_16 [1] : vector<32x32xf32> to vector<32xf32>
    %37 = vector.shape_cast %36 : vector<32xf32> to vector<32x1xf32>
    %38 = tpu.reciprocal %37 : vector<32x1xf32> -> vector<32x1xf32>
    %39 = vector.broadcast %38 : vector<32x1xf32> to vector<32x32xf32>
    %40 = arith.mulf %35, %39 : vector<32x32xf32>
    %cst_17 = arith.constant dense<0.000000e+00> : vector<32x32xf32>
    %41 = tpu.matmul %40, %28, %cst_17 {dimension_numbers = #tpu.dot_dimension_numbers<[1], [0], [0], [1], [0, 0, 1, 1], [], []>} : vector<32x32xf32>, vector<32x32xf32>, vector<32x32xf32> -> vector<32x32xf32>
    %42 = vector.extract_strided_slice %24 {offsets = [0, 32], sizes = [32, 32], strides = [1, 1]} : vector<32x384xf32> to vector<32x32xf32>
    %43 = vector.extract_strided_slice %24 {offsets = [0, 160], sizes = [32, 32], strides = [1, 1]} : vector<32x384xf32> to vector<32x32xf32>
    %44 = vector.extract_strided_slice %24 {offsets = [0, 288], sizes = [32, 32], strides = [1, 1]} : vector<32x384xf32> to vector<32x32xf32>
    %cst_18 = arith.constant dense<0.000000e+00> : vector<32x32xf32>
    %45 = tpu.matmul %42, %43, %cst_18 {dimension_numbers = #tpu.dot_dimension_numbers<[1], [1], [0], [0], [0, 0, 1, 0], [], []>} : vector<32x32xf32>, vector<32x32xf32>, vector<32x32xf32> -> vector<32x32xf32>
    %46 = arith.addf %45, %25 : vector<32x32xf32>
    %cst_19 = arith.constant dense<0xFF800000> : vector<32xf32>
    %47 = vector.multi_reduction <maximumf>, %46, %cst_19 [1] : vector<32x32xf32> to vector<32xf32>
    %48 = vector.shape_cast %47 : vector<32xf32> to vector<32x1xf32>
    %49 = vector.broadcast %48 : vector<32x1xf32> to vector<32x32xf32>
    %50 = arith.subf %46, %49 : vector<32x32xf32>
    %51 = math.exp %50 : vector<32x32xf32>
    %cst_20 = arith.constant dense<0.000000e+00> : vector<32xf32>
    %52 = vector.multi_reduction <add>, %51, %cst_20 [1] : vector<32x32xf32> to vector<32xf32>
    %53 = vector.shape_cast %52 : vector<32xf32> to vector<32x1xf32>
    %54 = tpu.reciprocal %53 : vector<32x1xf32> -> vector<32x1xf32>
    %55 = vector.broadcast %54 : vector<32x1xf32> to vector<32x32xf32>
    %56 = arith.mulf %51, %55 : vector<32x32xf32>
    %cst_21 = arith.constant dense<0.000000e+00> : vector<32x32xf32>
    %57 = tpu.matmul %56, %44, %cst_21 {dimension_numbers = #tpu.dot_dimension_numbers<[1], [0], [0], [1], [0, 0, 1, 1], [], []>} : vector<32x32xf32>, vector<32x32xf32>, vector<32x32xf32> -> vector<32x32xf32>
    %58 = vector.extract_strided_slice %24 {offsets = [0, 64], sizes = [32, 32], strides = [1, 1]} : vector<32x384xf32> to vector<32x32xf32>
    %59 = vector.extract_strided_slice %24 {offsets = [0, 192], sizes = [32, 32], strides = [1, 1]} : vector<32x384xf32> to vector<32x32xf32>
    %60 = vector.extract_strided_slice %24 {offsets = [0, 320], sizes = [32, 32], strides = [1, 1]} : vector<32x384xf32> to vector<32x32xf32>
    %cst_22 = arith.constant dense<0.000000e+00> : vector<32x32xf32>
    %61 = tpu.matmul %58, %59, %cst_22 {dimension_numbers = #tpu.dot_dimension_numbers<[1], [1], [0], [0], [0, 0, 1, 0], [], []>} : vector<32x32xf32>, vector<32x32xf32>, vector<32x32xf32> -> vector<32x32xf32>
    %62 = arith.addf %61, %25 : vector<32x32xf32>
    %cst_23 = arith.constant dense<0xFF800000> : vector<32xf32>
    %63 = vector.multi_reduction <maximumf>, %62, %cst_23 [1] : vector<32x32xf32> to vector<32xf32>
    %64 = vector.shape_cast %63 : vector<32xf32> to vector<32x1xf32>
    %65 = vector.broadcast %64 : vector<32x1xf32> to vector<32x32xf32>
    %66 = arith.subf %62, %65 : vector<32x32xf32>
    %67 = math.exp %66 : vector<32x32xf32>
    %cst_24 = arith.constant dense<0.000000e+00> : vector<32xf32>
    %68 = vector.multi_reduction <add>, %67, %cst_24 [1] : vector<32x32xf32> to vector<32xf32>
    %69 = vector.shape_cast %68 : vector<32xf32> to vector<32x1xf32>
    %70 = tpu.reciprocal %69 : vector<32x1xf32> -> vector<32x1xf32>
    %71 = vector.broadcast %70 : vector<32x1xf32> to vector<32x32xf32>
    %72 = arith.mulf %67, %71 : vector<32x32xf32>
    %cst_25 = arith.constant dense<0.000000e+00> : vector<32x32xf32>
    %73 = tpu.matmul %72, %60, %cst_25 {dimension_numbers = #tpu.dot_dimension_numbers<[1], [0], [0], [1], [0, 0, 1, 1], [], []>} : vector<32x32xf32>, vector<32x32xf32>, vector<32x32xf32> -> vector<32x32xf32>
    %74 = vector.extract_strided_slice %24 {offsets = [0, 96], sizes = [32, 32], strides = [1, 1]} : vector<32x384xf32> to vector<32x32xf32>
    %75 = vector.extract_strided_slice %24 {offsets = [0, 224], sizes = [32, 32], strides = [1, 1]} : vector<32x384xf32> to vector<32x32xf32>
    %76 = vector.extract_strided_slice %24 {offsets = [0, 352], sizes = [32, 32], strides = [1, 1]} : vector<32x384xf32> to vector<32x32xf32>
    %cst_26 = arith.constant dense<0.000000e+00> : vector<32x32xf32>
    %77 = tpu.matmul %74, %75, %cst_26 {dimension_numbers = #tpu.dot_dimension_numbers<[1], [1], [0], [0], [0, 0, 1, 0], [], []>} : vector<32x32xf32>, vector<32x32xf32>, vector<32x32xf32> -> vector<32x32xf32>
    %78 = arith.addf %77, %25 : vector<32x32xf32>
    %cst_27 = arith.constant dense<0xFF800000> : vector<32xf32>
    %79 = vector.multi_reduction <maximumf>, %78, %cst_27 [1] : vector<32x32xf32> to vector<32xf32>
    %80 = vector.shape_cast %79 : vector<32xf32> to vector<32x1xf32>
    %81 = vector.broadcast %80 : vector<32x1xf32> to vector<32x32xf32>
    %82 = arith.subf %78, %81 : vector<32x32xf32>
    %83 = math.exp %82 : vector<32x32xf32>
    %cst_28 = arith.constant dense<0.000000e+00> : vector<32xf32>
    %84 = vector.multi_reduction <add>, %83, %cst_28 [1] : vector<32x32xf32> to vector<32xf32>
    %85 = vector.shape_cast %84 : vector<32xf32> to vector<32x1xf32>
    %86 = tpu.reciprocal %85 : vector<32x1xf32> -> vector<32x1xf32>
    %87 = vector.broadcast %86 : vector<32x1xf32> to vector<32x32xf32>
    %88 = arith.mulf %83, %87 : vector<32x32xf32>
    %cst_29 = arith.constant dense<0.000000e+00> : vector<32x32xf32>
    %89 = tpu.matmul %88, %76, %cst_29 {dimension_numbers = #tpu.dot_dimension_numbers<[1], [0], [0], [1], [0, 0, 1, 1], [], []>} : vector<32x32xf32>, vector<32x32xf32>, vector<32x32xf32> -> vector<32x32xf32>
    %90 = tpu.concatenate %41, %57, %73, %89 in 1 : vector<32x32xf32>, vector<32x32xf32>, vector<32x32xf32>, vector<32x32xf32> -> vector<32x128xf32>
    %c0_30 = arith.constant 0 : index
    %c0_31 = arith.constant 0 : index
    %91 = vector.load %arg5[%c0_30, %c0_31] : memref<128x128xf32, #tpu.memory_space<vmem>>, vector<128x128xf32>
    %cst_32 = arith.constant dense<0.000000e+00> : vector<32x128xf32>
    %92 = tpu.matmul %90, %91, %cst_32 {dimension_numbers = #tpu.dot_dimension_numbers<[1], [0], [0], [1], [0, 0, 1, 1], [], []>} : vector<32x128xf32>, vector<128x128xf32>, vector<32x128xf32> -> vector<32x128xf32>
    %93 = arith.addf %0, %92 : vector<32x128xf32>
    %cst_33 = arith.constant dense<0.000000e+00> : vector<32xf32>
    %94 = vector.multi_reduction <add>, %93, %cst_33 [1] : vector<32x128xf32> to vector<32xf32>
    %95 = vector.shape_cast %94 : vector<32xf32> to vector<32x1xf32>
    %cst_34 = arith.constant 1.280000e+02 : f32
    %96 = vector.broadcast %cst_34 : f32 to vector<32x1xf32>
    %97 = arith.divf %95, %96 : vector<32x1xf32>
    %98 = vector.broadcast %97 : vector<32x1xf32> to vector<32x128xf32>
    %99 = arith.subf %93, %98 : vector<32x128xf32>
    %100 = arith.mulf %99, %99 : vector<32x128xf32>
    %cst_35 = arith.constant dense<0.000000e+00> : vector<32xf32>
    %101 = vector.multi_reduction <add>, %100, %cst_35 [1] : vector<32x128xf32> to vector<32xf32>
    %102 = vector.shape_cast %101 : vector<32xf32> to vector<32x1xf32>
    %cst_36 = arith.constant 1.280000e+02 : f32
    %103 = vector.broadcast %cst_36 : f32 to vector<32x1xf32>
    %104 = arith.divf %102, %103 : vector<32x1xf32>
    %cst_37 = arith.constant 9.99999974E-6 : f32
    %105 = vector.broadcast %cst_37 : f32 to vector<32x1xf32>
    %106 = arith.addf %104, %105 : vector<32x1xf32>
    %107 = math.rsqrt %106 : vector<32x1xf32>
    %108 = vector.broadcast %107 : vector<32x1xf32> to vector<32x128xf32>
    %109 = arith.mulf %99, %108 : vector<32x128xf32>
    %c0_38 = arith.constant 0 : index
    %c0_39 = arith.constant 0 : index
    %110 = vector.load %arg6[%c0_38, %c0_39] : memref<1x128xf32, #tpu.memory_space<vmem>>, vector<1x128xf32>
    %111 = vector.broadcast %110 : vector<1x128xf32> to vector<32x128xf32>
    %112 = arith.mulf %109, %111 : vector<32x128xf32>
    %c0_40 = arith.constant 0 : index
    %c0_41 = arith.constant 0 : index
    %113 = vector.load %arg7[%c0_40, %c0_41] : memref<1x128xf32, #tpu.memory_space<vmem>>, vector<1x128xf32>
    %114 = vector.broadcast %113 : vector<1x128xf32> to vector<32x128xf32>
    %115 = arith.addf %112, %114 : vector<32x128xf32>
    %c0_42 = arith.constant 0 : index
    %c0_43 = arith.constant 0 : index
    %116 = vector.load %arg9[%c0_42, %c0_43] : memref<32x128xf32, #tpu.memory_space<vmem>>, vector<32x128xf32>
    tpu.vector_store %arg9[%c0_42, %c0_43], %115 {strides = array<i32>} : memref<32x128xf32, #tpu.memory_space<vmem>>, vector<32x128xf32>,
    return
  }
  func.func @transform_0(%arg0: i32) -> (i32, i32) {
    %c0_i32 = arith.constant 0 : i32
    %c0_i32_0 = arith.constant 0 : i32
    return %arg0, %c0_i32 : i32, i32
  }
  func.func @transform_1(%arg0: i32) -> (i32, i32) {
    %c0_i32 = arith.constant 0 : i32
    %c0_i32_0 = arith.constant 0 : i32
    %c0_i32_1 = arith.constant 0 : i32
    return %c0_i32, %c0_i32_0 : i32, i32
  }
  func.func @transform_2(%arg0: i32) -> (i32, i32) {
    %c0_i32 = arith.constant 0 : i32
    %c0_i32_0 = arith.constant 0 : i32
    %c0_i32_1 = arith.constant 0 : i32
    return %c0_i32, %c0_i32_0 : i32, i32
  }
  func.func @transform_3(%arg0: i32) -> (i32, i32) {
    %c0_i32 = arith.constant 0 : i32
    %c0_i32_0 = arith.constant 0 : i32
    %c0_i32_1 = arith.constant 0 : i32
    return %c0_i32, %c0_i32_0 : i32, i32
  }
  func.func @transform_4(%arg0: i32) -> (i32, i32) {
    %c0_i32 = arith.constant 0 : i32
    %c0_i32_0 = arith.constant 0 : i32
    %c0_i32_1 = arith.constant 0 : i32
    return %c0_i32, %c0_i32_0 : i32, i32
  }
  func.func @transform_5(%arg0: i32) -> (i32, i32) {
    %c0_i32 = arith.constant 0 : i32
    %c0_i32_0 = arith.constant 0 : i32
    %c0_i32_1 = arith.constant 0 : i32
    return %c0_i32, %c0_i32_0 : i32, i32
  }
  func.func @transform_6(%arg0: i32) -> (i32, i32) {
    %c0_i32 = arith.constant 0 : i32
    %c0_i32_0 = arith.constant 0 : i32
    %c0_i32_1 = arith.constant 0 : i32
    return %c0_i32, %c0_i32_0 : i32, i32
  }
  func.func @transform_7(%arg0: i32) -> (i32, i32) {
    %c0_i32 = arith.constant 0 : i32
    %c0_i32_0 = arith.constant 0 : i32
    %c0_i32_1 = arith.constant 0 : i32
    return %c0_i32, %c0_i32_0 : i32, i32
  }
  func.func @transform_8(%arg0: i32) -> (i32, i32) {
    %c0_i32 = arith.constant 0 : i32
    %c0_i32_0 = arith.constant 0 : i32
    return %arg0, %c0_i32 : i32, i32
  }
}

module attributes {stable_mosaic.version = 11 : i64} {
  func.func @_conv_gelu_res_kernel(%arg0: i32, %arg1: memref<32x128xf32, #tpu.memory_space<vmem>>, %arg2: memref<5x32x160xf32, #tpu.memory_space<vmem>>, %arg3: memref<5x160x128xf32, #tpu.memory_space<vmem>>, %arg4: memref<1x128xf32, #tpu.memory_space<vmem>>, %arg5: memref<32x128xf32, #tpu.memory_space<vmem>>) attributes {dimension_semantics = [#tpu.dimension_semantics<arbitrary>], iteration_bounds = array<i64: 1>, scalar_prefetch = 0 : i64, scratch_operands = 0 : i64, tpu.core_type = #tpu.core_type<tc>, window_params = [{pipeline_mode = #tpu.pipeline_mode<synchronous>, transform_indices = @transform_0, window_bounds = array<i64: 32, 128>}, {pipeline_mode = #tpu.pipeline_mode<synchronous>, transform_indices = @transform_1, window_bounds = array<i64: 5, 32, 160>}, {pipeline_mode = #tpu.pipeline_mode<synchronous>, transform_indices = @transform_2, window_bounds = array<i64: 5, 160, 128>}, {pipeline_mode = #tpu.pipeline_mode<synchronous>, transform_indices = @transform_3, window_bounds = array<i64: 1, 128>}, {pipeline_mode = #tpu.pipeline_mode<synchronous>, transform_indices = @transform_4, window_bounds = array<i64: 32, 128>}]} {
    %cst = arith.constant 0.000000e+00 : f32
    %0 = vector.broadcast %cst : f32 to vector<32x128xf32>
    %c0 = arith.constant 0 : index
    %c0_0 = arith.constant 0 : index
    %c0_1 = arith.constant 0 : index
    %1 = vector.load %arg2[%c0, %c0_0, %c0_1] : memref<5x32x160xf32, #tpu.memory_space<vmem>>, vector<1x32x160xf32>
    %2 = vector.shape_cast %1 : vector<1x32x160xf32> to vector<32x160xf32>
    %c0_2 = arith.constant 0 : index
    %c0_3 = arith.constant 0 : index
    %c0_4 = arith.constant 0 : index
    %3 = vector.load %arg3[%c0_2, %c0_3, %c0_4] : memref<5x160x128xf32, #tpu.memory_space<vmem>>, vector<1x160x128xf32>
    %4 = vector.shape_cast %3 : vector<1x160x128xf32> to vector<160x128xf32>
    %cst_5 = arith.constant dense<0.000000e+00> : vector<32x128xf32>
    %5 = tpu.matmul %2, %4, %cst_5 {dimension_numbers = #tpu.dot_dimension_numbers<[1], [0], [0], [1], [0, 0, 1, 1], [], []>} : vector<32x160xf32>, vector<160x128xf32>, vector<32x128xf32> -> vector<32x128xf32>
    %6 = arith.addf %0, %5 : vector<32x128xf32>
    %c1 = arith.constant 1 : index
    %c0_6 = arith.constant 0 : index
    %c0_7 = arith.constant 0 : index
    %7 = vector.load %arg2[%c1, %c0_6, %c0_7] : memref<5x32x160xf32, #tpu.memory_space<vmem>>, vector<1x32x160xf32>
    %8 = vector.shape_cast %7 : vector<1x32x160xf32> to vector<32x160xf32>
    %c1_8 = arith.constant 1 : index
    %c0_9 = arith.constant 0 : index
    %c0_10 = arith.constant 0 : index
    %9 = vector.load %arg3[%c1_8, %c0_9, %c0_10] : memref<5x160x128xf32, #tpu.memory_space<vmem>>, vector<1x160x128xf32>
    %10 = vector.shape_cast %9 : vector<1x160x128xf32> to vector<160x128xf32>
    %cst_11 = arith.constant dense<0.000000e+00> : vector<32x128xf32>
    %11 = tpu.matmul %8, %10, %cst_11 {dimension_numbers = #tpu.dot_dimension_numbers<[1], [0], [0], [1], [0, 0, 1, 1], [], []>} : vector<32x160xf32>, vector<160x128xf32>, vector<32x128xf32> -> vector<32x128xf32>
    %12 = arith.addf %6, %11 : vector<32x128xf32>
    %c2 = arith.constant 2 : index
    %c0_12 = arith.constant 0 : index
    %c0_13 = arith.constant 0 : index
    %13 = vector.load %arg2[%c2, %c0_12, %c0_13] : memref<5x32x160xf32, #tpu.memory_space<vmem>>, vector<1x32x160xf32>
    %14 = vector.shape_cast %13 : vector<1x32x160xf32> to vector<32x160xf32>
    %c2_14 = arith.constant 2 : index
    %c0_15 = arith.constant 0 : index
    %c0_16 = arith.constant 0 : index
    %15 = vector.load %arg3[%c2_14, %c0_15, %c0_16] : memref<5x160x128xf32, #tpu.memory_space<vmem>>, vector<1x160x128xf32>
    %16 = vector.shape_cast %15 : vector<1x160x128xf32> to vector<160x128xf32>
    %cst_17 = arith.constant dense<0.000000e+00> : vector<32x128xf32>
    %17 = tpu.matmul %14, %16, %cst_17 {dimension_numbers = #tpu.dot_dimension_numbers<[1], [0], [0], [1], [0, 0, 1, 1], [], []>} : vector<32x160xf32>, vector<160x128xf32>, vector<32x128xf32> -> vector<32x128xf32>
    %18 = arith.addf %12, %17 : vector<32x128xf32>
    %c3 = arith.constant 3 : index
    %c0_18 = arith.constant 0 : index
    %c0_19 = arith.constant 0 : index
    %19 = vector.load %arg2[%c3, %c0_18, %c0_19] : memref<5x32x160xf32, #tpu.memory_space<vmem>>, vector<1x32x160xf32>
    %20 = vector.shape_cast %19 : vector<1x32x160xf32> to vector<32x160xf32>
    %c3_20 = arith.constant 3 : index
    %c0_21 = arith.constant 0 : index
    %c0_22 = arith.constant 0 : index
    %21 = vector.load %arg3[%c3_20, %c0_21, %c0_22] : memref<5x160x128xf32, #tpu.memory_space<vmem>>, vector<1x160x128xf32>
    %22 = vector.shape_cast %21 : vector<1x160x128xf32> to vector<160x128xf32>
    %cst_23 = arith.constant dense<0.000000e+00> : vector<32x128xf32>
    %23 = tpu.matmul %20, %22, %cst_23 {dimension_numbers = #tpu.dot_dimension_numbers<[1], [0], [0], [1], [0, 0, 1, 1], [], []>} : vector<32x160xf32>, vector<160x128xf32>, vector<32x128xf32> -> vector<32x128xf32>
    %24 = arith.addf %18, %23 : vector<32x128xf32>
    %c4 = arith.constant 4 : index
    %c0_24 = arith.constant 0 : index
    %c0_25 = arith.constant 0 : index
    %25 = vector.load %arg2[%c4, %c0_24, %c0_25] : memref<5x32x160xf32, #tpu.memory_space<vmem>>, vector<1x32x160xf32>
    %26 = vector.shape_cast %25 : vector<1x32x160xf32> to vector<32x160xf32>
    %c4_26 = arith.constant 4 : index
    %c0_27 = arith.constant 0 : index
    %c0_28 = arith.constant 0 : index
    %27 = vector.load %arg3[%c4_26, %c0_27, %c0_28] : memref<5x160x128xf32, #tpu.memory_space<vmem>>, vector<1x160x128xf32>
    %28 = vector.shape_cast %27 : vector<1x160x128xf32> to vector<160x128xf32>
    %cst_29 = arith.constant dense<0.000000e+00> : vector<32x128xf32>
    %29 = tpu.matmul %26, %28, %cst_29 {dimension_numbers = #tpu.dot_dimension_numbers<[1], [0], [0], [1], [0, 0, 1, 1], [], []>} : vector<32x160xf32>, vector<160x128xf32>, vector<32x128xf32> -> vector<32x128xf32>
    %30 = arith.addf %24, %29 : vector<32x128xf32>
    %c0_30 = arith.constant 0 : index
    %c0_31 = arith.constant 0 : index
    %31 = vector.load %arg4[%c0_30, %c0_31] : memref<1x128xf32, #tpu.memory_space<vmem>>, vector<1x128xf32>
    %32 = vector.broadcast %31 : vector<1x128xf32> to vector<32x128xf32>
    %33 = arith.addf %30, %32 : vector<32x128xf32>
    %cst_32 = arith.constant 5.000000e-01 : f32
    %34 = vector.broadcast %cst_32 : f32 to vector<32x128xf32>
    %35 = arith.mulf %34, %33 : vector<32x128xf32>
    %cst_33 = arith.constant 4.471500e-02 : f32
    %36 = vector.broadcast %cst_33 : f32 to vector<32x128xf32>
    %37 = arith.mulf %36, %33 : vector<32x128xf32>
    %38 = arith.mulf %37, %33 : vector<32x128xf32>
    %39 = arith.mulf %38, %33 : vector<32x128xf32>
    %40 = arith.addf %33, %39 : vector<32x128xf32>
    %cst_34 = arith.constant 0.797884583 : f32
    %41 = vector.broadcast %cst_34 : f32 to vector<32x128xf32>
    %42 = arith.mulf %41, %40 : vector<32x128xf32>
    %43 = math.tanh %42 : vector<32x128xf32>
    %cst_35 = arith.constant 1.000000e+00 : f32
    %44 = vector.broadcast %cst_35 : f32 to vector<32x128xf32>
    %45 = arith.addf %44, %43 : vector<32x128xf32>
    %46 = arith.mulf %35, %45 : vector<32x128xf32>
    %c0_36 = arith.constant 0 : index
    %c0_37 = arith.constant 0 : index
    %47 = vector.load %arg1[%c0_36, %c0_37] : memref<32x128xf32, #tpu.memory_space<vmem>>, vector<32x128xf32>
    %48 = arith.addf %47, %46 : vector<32x128xf32>
    %c0_38 = arith.constant 0 : index
    %c0_39 = arith.constant 0 : index
    %49 = vector.load %arg5[%c0_38, %c0_39] : memref<32x128xf32, #tpu.memory_space<vmem>>, vector<32x128xf32>
    tpu.vector_store %arg5[%c0_38, %c0_39], %48 {strides = array<i32>} : memref<32x128xf32, #tpu.memory_space<vmem>>, vector<32x128xf32>,
    return
  }
  func.func @transform_0(%arg0: i32) -> (i32, i32) {
    %c0_i32 = arith.constant 0 : i32
    %c0_i32_0 = arith.constant 0 : i32
    %c0_i32_1 = arith.constant 0 : i32
    return %c0_i32, %c0_i32_0 : i32, i32
  }
  func.func @transform_1(%arg0: i32) -> (i32, i32, i32) {
    %c0_i32 = arith.constant 0 : i32
    %c0_i32_0 = arith.constant 0 : i32
    %c0_i32_1 = arith.constant 0 : i32
    %c0_i32_2 = arith.constant 0 : i32
    return %c0_i32, %c0_i32_0, %c0_i32_1 : i32, i32, i32
  }
  func.func @transform_2(%arg0: i32) -> (i32, i32, i32) {
    %c0_i32 = arith.constant 0 : i32
    %c0_i32_0 = arith.constant 0 : i32
    %c0_i32_1 = arith.constant 0 : i32
    %c0_i32_2 = arith.constant 0 : i32
    return %c0_i32, %c0_i32_0, %c0_i32_1 : i32, i32, i32
  }
  func.func @transform_3(%arg0: i32) -> (i32, i32) {
    %c0_i32 = arith.constant 0 : i32
    %c0_i32_0 = arith.constant 0 : i32
    %c0_i32_1 = arith.constant 0 : i32
    return %c0_i32, %c0_i32_0 : i32, i32
  }
  func.func @transform_4(%arg0: i32) -> (i32, i32) {
    %c0_i32 = arith.constant 0 : i32
    %c0_i32_0 = arith.constant 0 : i32
    %c0_i32_1 = arith.constant 0 : i32
    return %c0_i32, %c0_i32_0 : i32, i32
  }
}

</mosaic_0001>

<bundles_post_ra>
// kernel: cbformer_forward.2
= control target key start
LH: loop header
LB: loop body
LE: loop exit
PB: predicated region body
PF: predicated region fallthrough
CT: control target
= control target key end

     0   :  { %vm326_vm0 = vcmask 261120   ;;  %s2332_s30 = smov 64   ;;  %s2333_s9 = smov 32   ;;  %vm1443_vm2 = vcmask 523264   ;;  %vm1448_vm3 = vcmask 785408   ;;  %s2945_s0 = inlined_call_operand.vmem [shape: f32[32,128], index: 0, kind: input, shape index: {}]   ;;  %s2946_s3 = inlined_call_operand.vmem [shape: f32[128,384], index: 3, kind: input, shape index: {}]   ;;  %s2947_s1 = inlined_call_operand.vmem [shape: f32[1,128], index: 1, kind: input, shape index: {}]   ;;  %s2948_s2 = inlined_call_operand.vmem [shape: f32[1,128], index: 2, kind: input, shape index: {}]   ;;  %s2949_s7 = inlined_call_operand.vmem [shape: f32[32,32], index: 7, kind: input, shape index: {}]   ;;  %s2950_s4 = inlined_call_operand.vmem [shape: f32[128,128], index: 4, kind: input, shape index: {}]   ;;  %s2951_s5 = inlined_call_operand.vmem [shape: f32[1,128], index: 5, kind: input, shape index: {}]   ;;  %s2952_s6 = inlined_call_operand.vmem [shape: f32[1,128], index: 6, kind: input, shape index: {}]   ;;  %s2953_s8 = inlined_call_operand.vmem [shape: f32[32,128], index: 8, kind: output, shape index: {}]  }
   0x1   :  { %v29_v0 = vld [vmem:[%s2945_s0] sm:$0xff]  ;;  %v31_v1 = vld [vmem:[%s2945_s0 + $0x10] sm:$0xff]  ;;  %v30_v2 = vld [vmem:[%s2945_s0 + $0x8] sm:$0xff] }
   0x2   :  { %33 = vadd.xlane.f32.xlu0 %v29_v0  ;;  %37 = vadd.xlane.f32.xlu1 %v31_v1  ;;  %v32_v3 = vld [vmem:[%s2945_s0 + $0x18] sm:$0xff]  ;;  %v101_v4 = vld [vmem:[%s2946_s3 + $0x8] sm:$0xff]  ;;  %v104_v5 = vld [vmem:[%s2946_s3 + $0x20] sm:$0xff] }
   0x3   :  { %v100_v6 = vld [vmem:[%s2946_s3] sm:$0xff]  ;;  %v1976_v7 = vpack.c.bf16 %v104_v5, %v101_v4  ;;  %v103_v8 = vld [vmem:[%s2946_s3 + $0x18] sm:$0xff]  ;;  %v110_v10 = vld [vmem:[%s2946_s3 + $0x50] sm:$0xff] }
   0x4   :  { %v107_v9 = vld [vmem:[%s2946_s3 + $0x38] sm:$0xff]  ;;  %v1978_v11 = vpack.c.bf16 %v103_v8, %v100_v6  ;;  %v102_v13 = vld [vmem:[%s2946_s3 + $0x10] sm:$0xff]  ;;  %v105_v14 = vld [vmem:[%s2946_s3 + $0x28] sm:$0xff] }
   0x5   :  { %v1980_v12 = vpack.c.bf16 %v110_v10, %v107_v9  ;;  %v106_v15 = vld [vmem:[%s2946_s3 + $0x30] sm:$0xff]  ;;  %1977 = vmatprep.subr.bf16.mxu0 %v1976_v7  ;;  %v2008_v16 = vpack.c.bf16 %v105_v14, %v102_v13  ;;  %v109_v17 = vld [vmem:[%s2946_s3 + $0x48] sm:$0xff]  ;;  %v116_v19 = vld [vmem:[%s2946_s3 + $0x80] sm:$0xff] }
   0x6   :  { %35 = vadd.xlane.f32.xlu0 %v30_v2  ;;  %39 = vadd.xlane.f32.xlu1 %v32_v3  ;;  %v113_v18 = vld [vmem:[%s2946_s3 + $0x68] sm:$0xff]  ;;  %v1982_v20 = vpack.c.bf16 %v109_v17, %v106_v15  ;;  %v108_v21 = vld [vmem:[%s2946_s3 + $0x40] sm:$0xff]  ;;  %v111_v22 = vld [vmem:[%s2946_s3 + $0x58] sm:$0xff] }
   0x7   :  { %1979 = vmatpush1.bf16.msra.mxu0 %v1978_v11  ;;  %2009 = vmatprep.subr.bf16.mxu1 %v2008_v16  ;;  %v1984_v23 = vpack.c.bf16 %v116_v19, %v113_v18  ;;  %v2012_v24 = vpack.c.bf16 %v111_v22, %v108_v21  ;;  %v112_v25 = vld [vmem:[%s2946_s3 + $0x60] sm:$0xff]  ;;  %v115_v26 = vld [vmem:[%s2946_s3 + $0x78] sm:$0xff]  ;;  %v122_v45 = vld [vmem:[%s2946_s3 + $0xb0] sm:$0xff]  ;;  %v2330_v19 = vmov 0.0  }
   0x8   :  { %1981 = vmatprep.subr.bf16.mxu0 %v1980_v12  ;;  %2011 = vmatpush3.bf16.msra.mxu1 %v2008_v16  ;;  %v1986_v27 = vpack.c.bf16 %v115_v26, %v112_v25  ;;  %v119_v44 = vld [vmem:[%s2946_s3 + $0x98] sm:$0xff]  ;;  %v114_v46 = vld [vmem:[%s2946_s3 + $0x70] sm:$0xff]  ;;  %v117_v48 = vld [vmem:[%s2946_s3 + $0x88] sm:$0xff] }
   0x9   :  { %2013 = vmatprep.subr.bf16.mxu1 %v2012_v24  ;;  %v1988_v47 = vpack.c.bf16 %v122_v45, %v119_v44  ;;  %v118_v49 = vld [vmem:[%s2946_s3 + $0x90] sm:$0xff]  ;;  %v121_v50 = vld [vmem:[%s2946_s3 + $0xa8] sm:$0xff]  ;;  %v2016_v51 = vpack.c.bf16 %v117_v48, %v114_v46  ;;  %v128_v54 = vld [vmem:[%s2946_s3 + $0xe0] sm:$0xff]  ;;  %212 = vmatprep.mubr.f32.mxu0 %v2330_v19 }
   0xa   :  { %v1990_v52 = vpack.c.bf16 %v121_v50, %v118_v49  ;;  %v125_v53 = vld [vmem:[%s2946_s3 + $0xc8] sm:$0xff]  ;;  %v120_v55 = vld [vmem:[%s2946_s3 + $0xa0] sm:$0xff]  ;;  %v123_v57 = vld [vmem:[%s2946_s3 + $0xb8] sm:$0xff] }
   0xb   :  { %1983 = vmatpush1.bf16.msra.mxu0 %v1982_v20  ;;  %v1992_v56 = vpack.c.bf16 %v128_v54, %v125_v53  ;;  %v124_v58 = vld [vmem:[%s2946_s3 + $0xc0] sm:$0xff]  ;;  %v127_v59 = vld [vmem:[%s2946_s3 + $0xd8] sm:$0xff]  ;;  %v2020_v60 = vpack.c.bf16 %v123_v57, %v120_v55  ;;  %v134_v63 = vld [vmem:[%s2946_s3 + $0x110] sm:$0xff] }
   0xc   :  { %1985 = vmatprep.subr.bf16.mxu0 %v1984_v23  ;;  %2015 = vmatpush3.bf16.msra.mxu1 %v2012_v24  ;;  %v1994_v61 = vpack.c.bf16 %v127_v59, %v124_v58  ;;  %v131_v62 = vld [vmem:[%s2946_s3 + $0xf8] sm:$0xff]  ;;  %v133_v4 = vld [vmem:[%s2946_s3 + $0x108] sm:$0xff]  ;;  %v140_v8 = vld [vmem:[%s2946_s3 + $0x140] sm:$0xff] }
   0xd   :  { %2017 = vmatprep.subr.bf16.mxu1 %v2016_v51  ;;  %v137_v7 = vld [vmem:[%s2946_s3 + $0x128] sm:$0xff]  ;;  %v132_v9 = vld [vmem:[%s2946_s3 + $0x100] sm:$0xff]  ;;  %v135_v11 = vld [vmem:[%s2946_s3 + $0x118] sm:$0xff] }
   0xe   :  { %v2000_v10 = vpack.c.bf16 %v140_v8, %v137_v7  ;;  %v136_v12 = vld [vmem:[%s2946_s3 + $0x120] sm:$0xff]  ;;  %v139_v13 = vld [vmem:[%s2946_s3 + $0x138] sm:$0xff]  ;;  %v2028_v14 = vpack.c.bf16 %v135_v11, %v132_v9  ;;  %v146_v17 = vld [vmem:[%s2946_s3 + $0x170] sm:$0xff] }
   0xf   :  { %1987 = vmatpush1.bf16.msra.mxu0 %v1986_v27  ;;  %v2002_v15 = vpack.c.bf16 %v139_v13, %v136_v12  ;;  %v143_v16 = vld [vmem:[%s2946_s3 + $0x158] sm:$0xff]  ;;  %v138_v18 = vld [vmem:[%s2946_s3 + $0x130] sm:$0xff]  ;;  %v141_v21 = vld [vmem:[%s2946_s3 + $0x148] sm:$0xff] }
  0x10   :  { %1989 = vmatprep.subr.bf16.mxu0 %v1988_v47  ;;  %2019 = vmatpush3.bf16.msra.mxu1 %v2016_v51  ;;  %v2004_v20 = vpack.c.bf16 %v146_v17, %v143_v16  ;;  %v142_v22 = vld [vmem:[%s2946_s3 + $0x150] sm:$0xff]  ;;  %v145_v23 = vld [vmem:[%s2946_s3 + $0x168] sm:$0xff]  ;;  %v2032_v24 = vpack.c.bf16 %v141_v21, %v138_v18  ;;  %v144_v26 = vld [vmem:[%s2946_s3 + $0x160] sm:$0xff] }
  0x11   :  { %2021 = vmatprep.subr.bf16.mxu1 %v2020_v60  ;;  %v2006_v25 = vpack.c.bf16 %v145_v23, %v142_v22  ;;  %v147_v27 = vld [vmem:[%s2946_s3 + $0x178] sm:$0xff]  ;;  %v1632_v46 = vld [vmem:[%s2947_s1] ss:$0 sm:$0xff]  ;;  %vm2573_vm1 = vmpackc.low %vm326_vm0, %vm326_vm0 }
  0x12   :  { %v1633_v48 = vld [vmem:[%s2948_s2] ss:$0 sm:$0xff]  ;;  %v2606_v16 = vld [vmem:[%s2949_s7 + $0x8] sm:$0xff]  ;;  %v2618_v22 = vld [vmem:[%s2949_s7 + $0x18] sm:$0xff] }
  0x13   :  { %1991 = vmatpush1.bf16.msra.mxu0 %v1990_v52  ;;  %v2611_v17 = vld [vmem:[%s2949_s7] sm:$0xff] }
  0x14   :  { %1993 = vmatprep.subr.bf16.mxu0 %v1992_v56  ;;  %2023 = vmatpush3.bf16.msra.mxu1 %v2020_v60 }
  0x17   :  { %1995 = vmatpush1.bf16.msra.mxu0 %v1994_v61 }
  0x8f   :  { %v34_v28 = vpop.xlane.xlu0 %33  ;;  %v38_v29 = vpop.xlane.xlu1 %37 }
  0x90   :  { %v42_v30 = vmul.f32 0.0078125, %v34_v28  ;;  %v44_v31 = vmul.f32 0.0078125, %v38_v29  ;;  %v2036_v28 = vpack.c.bf16 %v147_v27, %v144_v26 }
  0x92   :  { %v2439_v32 = vsub.f32 %v29_v0, %v42_v30  ;;  %v2441_v33 = vsub.f32 %v31_v1, %v44_v31  ;;  %v126_v0 = vld [vmem:[%s2946_s3 + $0xd0] sm:$0xff]  ;;  %v1996_v1 = vpack.c.bf16 %v134_v63, %v131_v62 }
  0x93   :  { %v36_v34 = vpop.xlane.xlu0 %35  ;;  %v40_v35 = vpop.xlane.xlu1 %39 }
  0x94   :  { %v43_v36 = vmul.f32 0.0078125, %v36_v34  ;;  %v50_v37 = vmul.f32 %v2439_v32, %v2439_v32  ;;  %v45_v38 = vmul.f32 0.0078125, %v40_v35  ;;  %v52_v41 = vmul.f32 %v2441_v33, %v2441_v33  ;;  %1997 = vmatprep.subr.bf16.mxu0 %v1996_v1 }
  0x96   :  { %v2445_v39 = vsub.f32 %v30_v2, %v43_v36  ;;  %54 = vadd.xlane.f32.xlu0 %v50_v37  ;;  %v2447_v40 = vsub.f32 %v32_v3, %v45_v38  ;;  %v129_v2 = vld [vmem:[%s2946_s3 + $0xe8] sm:$0xff]  ;;  %v130_v3 = vld [vmem:[%s2946_s3 + $0xf0] sm:$0xff] }
  0x97   :  { %v2024_v5 = vpack.c.bf16 %v129_v2, %v126_v0  ;;  %v1998_v6 = vpack.c.bf16 %v133_v4, %v130_v3 }
  0x98   :  { %v51_v42 = vmul.f32 %v2445_v39, %v2445_v39  ;;  %v53_v43 = vmul.f32 %v2447_v40, %v2447_v40 }
  0x99   :  { %2025 = vmatprep.subr.bf16.mxu1 %v2024_v5  ;;  %1999 = vmatpush1.bf16.msra.mxu0 %v1998_v6 }
  0x9a   :  { %58 = vadd.xlane.f32.xlu0 %v52_v41  ;;  %56 = vadd.xlane.f32.xlu1 %v51_v42 }
  0x9b   :  { %2027 = vmatpush3.bf16.msra.mxu1 %v2024_v5  ;;  %2001 = vmatprep.subr.bf16.mxu0 %v2000_v10 }
  0x9c   :  { %2029 = vmatprep.subr.bf16.mxu1 %v2028_v14 }
  0x9d   :  { %2003 = vmatpush1.bf16.msra.mxu0 %v2002_v15 }
  0x9e   :  { %60 = vadd.xlane.f32.xlu1 %v53_v43  ;;  %2005 = vmatprep.subr.bf16.mxu0 %v2004_v20 }
  0x9f   :  { %2031 = vmatpush3.bf16.msra.mxu1 %v2028_v14 }
  0xa0   :  { %2033 = vmatprep.subr.bf16.mxu1 %v2032_v24 }
  0xa1   :  { %2007 = vmatpush1.bf16.msra.mxu0 %v2006_v25 }
  0xa3   :  { %2035 = vmatpush3.bf16.msra.mxu1 %v2032_v24  ;;  %v2624_v24 = vld [vmem:[%s2949_s7 + $0x10] sm:$0xff]  ;;  %s2331_s7 = smov 96  }
  0xa4   :  { %2037 = vmatprep.subr.bf16.mxu1 %v2036_v28 }
  0xa7   :  { %2039 = vmatpush3.bf16.msra.mxu1 %v2036_v28 }
 0x123   :  { %v55_v29 = vpop.xlane.xlu0 %54 }
 0x124   :  { %v62_v30 = vmul.f32 0.0078125, %v55_v29 }
 0x126   :  { %v66_v31 = vadd.f32 1e-05, %v62_v30 }
 0x127   :  { %v57_v34 = vpop.xlane.xlu1 %56  ;;  %v59_v35 = vpop.xlane.xlu0 %58 }
 0x128   :  { %2246 = vrsqrt.f32 %v66_v31  ;;  %v63_v36 = vmul.f32 0.0078125, %v57_v34  ;;  %v64_v37 = vmul.f32 0.0078125, %v59_v35 }
 0x12a   :  { %v67_v38 = vadd.f32 1e-05, %v63_v36  ;;  %v68_v41 = vadd.f32 1e-05, %v64_v37 }
 0x12b   :  { %v61_v42 = vpop.xlane.xlu1 %60 }
 0x12c   :  { %2248 = vrsqrt.f32 %v67_v38  ;;  %v65_v43 = vmul.f32 0.0078125, %v61_v42 }
 0x12d   :  { %2250 = vrsqrt.f32 %v68_v41 }
 0x12e   :  { %v69_v44 = vadd.f32 1e-05, %v65_v43 }
 0x130   :  { %2252 = vrsqrt.f32 %v69_v44 }
 0x132   :  { %v2247_v45 = vpop.eup %2246 }
 0x133   :  { %v74_v47 = vmul.f32 %v2247_v45, %v2439_v32 }
 0x135   :  { %v85_v49 = vmul.f32 %v1632_v46, %v74_v47 }
 0x136   :  { %v2249_v50 = vpop.eup %2248 }
 0x137   :  { %v2251_v51 = vpop.eup %2250  ;;  %v96_v52 = vadd.f32 %v1633_v48, %v85_v49  ;;  %v75_v53 = vmul.f32 %v2249_v50, %v2445_v39 }
 0x138   :  { %v76_v54 = vmul.f32 %v2251_v51, %v2441_v33 }
 0x139   :  { %213 = vmatmul.mubr.f32.vlgmr.msra.gmra.mrb[0].mxu0 %v96_v52  ;;  %1820 = vmatprep.mubr.f32.mxu1 %v96_v52  ;;  %v86_v55 = vmul.f32 %v1632_v46, %v75_v53 }
 0x13a   :  { %v2253_v56 = vpop.eup %2252  ;;  %218 = vmatprep.mubr.f32.mxu0 %v2330_v19  ;;  %v87_v57 = vmul.f32 %v1632_v46, %v76_v54 }
 0x13b   :  { %v97_v32 = vadd.f32 %v1633_v48, %v86_v55  ;;  %v77_v58 = vmul.f32 %v2253_v56, %v2447_v40 }
 0x13c   :  { %v98_v59 = vadd.f32 %v1633_v48, %v87_v57 }
 0x13d   :  { %219 = vmatmul.mubr.f32.gmra.mrb[2].mxu0 %v97_v32  ;;  %1821 = vmatmul.mubr.f32.vlgmr.msra.gmra.mrb[0].mxu1 %v97_v32  ;;  %v88_v60 = vmul.f32 %v1632_v46, %v77_v58 }
 0x13e   :  { %1823 = vmatprep.mubr.f32.mxu1 %v98_v59  ;;  %224 = vmatprep.mubr.f32.mxu0 %v2330_v19 }
 0x13f   :  { %v99_v39 = vadd.f32 %v1633_v48, %v88_v60 }
 0x141   :  { %225 = vmatmul.mubr.f32.gmra.mrb[4].mxu0 %v98_v59  ;;  %1824 = vmatmul.mubr.f32.gmra.mrb[2].mxu1 %v99_v39 }
 0x142   :  { %230 = vmatprep.mubr.f32.mxu0 %v2330_v19 }
 0x145   :  { %231 = vmatmul.mubr.f32.gmra.mrb[6].mxu0 %v99_v39 }
 0x20c   :  { %v2565_v33 = vpop.f32.mrb[0].mxu0 }
 0x20d   :  { %v216_v61 = vpop.f32.mrb[1].mxu0  ;;  %1834 = vmatprep.mubr.msk.f32.mxu0 %vm326_vm0, %v2565_v33 }
 0x210   :  { %v2569_v40 = vpop.f32.mrb[2].mxu0  ;;  %v1822_v62 = vpop.f32.mrb[0].mxu1 }
 0x211   :  { %v222_v63 = vpop.f32.mrb[3].mxu0  ;;  %v303_v0 = vpop.f32.mrb[1].mxu1 }
 0x212   :  { %v2040_v2 = vpack.c.bf16 %v222_v63, %v216_v61  ;;  %v2052_v3 = vpack.c.bf16 %v1822_v62, %v303_v0  ;;  %v2577_v4 = vpack.i.bf16 %v222_v63, %v216_v61  ;;  %v2579_v5 = vpack.i.bf16 %v1822_v62, %v303_v0 }
 0x214   :  { %v2581_v6 = vpop.f32.mrb[4].mxu0  ;;  %v1825_v7 = vpop.f32.mrb[2].mxu1  ;;  %2042 = vmatprep.subr.msk.bf16.mxu0 %vm2573_vm1, %v2040_v2  ;;  %2053 = vmatprep.subr.bf16.mxu1 %v2052_v3 }
 0x215   :  { %v228_v8 = vpop.f32.mrb[5].mxu0  ;;  %v313_v9 = vpop.f32.mrb[3].mxu1  ;;  %2045 = vmatpush3.bf16.xpose.msk.msra.mxu0 %vm2573_vm1, %v2040_v2  ;;  %2055 = vmatpush3.bf16.msra.mxu1 %v2052_v3 }
 0x216   :  { %v2056_v10 = vpack.c.bf16 %v1825_v7, %v313_v9  ;;  %v2587_v11 = vpack.i.bf16 %v1825_v7, %v313_v9 }
 0x218   :  { %v2589_v12 = vpop.f32.mrb[6].mxu0  ;;  %2057 = vmatprep.subr.bf16.mxu1 %v2056_v10 }
 0x219   :  { %v234_v13 = vpop.f32.mrb[7].mxu0  ;;  %2059 = vmatpush3.bf16.msra.mxu1 %v2056_v10 }
 0x21a   :  { %v2046_v14 = vpack.c.bf16 %v234_v13, %v228_v8  ;;  %v2591_v15 = vpack.i.bf16 %v234_v13, %v228_v8 }
 0x21c   :  { %2048 = vmatprep.subr.msk.bf16.mxu0 %vm2573_vm1, %v2046_v14 }
 0x21d   :  { %2051 = vmatpush3.bf16.xpose.msk.msra.mxu0 %vm2573_vm1, %v2046_v14 }
 0x224   :  { %1835 = vmatmul.mubr.msk.f32.vlgmr.msra.gmra.mrb[8].mxu0 %vm326_vm0, %v2569_v40 }
 0x225   :  { %1837 = vmatprep.mubr.msk.f32.mxu0 %vm326_vm0, %v2581_v6 }
 0x228   :  { %1838 = vmatmul.mubr.msk.f32.gmra.mrb[10].mxu0 %vm326_vm0, %v2589_v12 }
 0x2f7   :  { %v1836_v18 = vpop.f32.mrb[8].mxu0 }
 0x2f8   :  { %v423_v19 = vadd.f32 %v1836_v18, %v2606_v16  ;;  %v417_v20 = vpop.f32.mrb[9].mxu0 }
 0x2f9   :  { %v418_v21 = vadd.f32 %v417_v20, %v2611_v17 }
 0x2fa   :  { %v439_v23 = vsel %vm326_vm0, %v423_v19, -inf }
 0x2fb   :  { %440 = vmax.xlane.f32.xlu1 %v439_v23  ;;  %v1839_v25 = vpop.f32.mrb[10].mxu0  ;;  %v436_v26 = vsel %vm326_vm0, %v418_v21, -inf }
 0x2fc   :  { %v433_v27 = vadd.f32 %v1839_v25, %v2618_v22  ;;  %v427_v28 = vpop.f32.mrb[11].mxu0  ;;  %437 = vmax.xlane.f32.xlu0 %v436_v26 }
 0x2fd   :  { %v428_v29 = vadd.f32 %v427_v28, %v2624_v24 }
 0x2fe   :  { %v445_v30 = vsel %vm326_vm0, %v433_v27, -inf }
 0x2ff   :  { %446 = vmax.xlane.f32.xlu1 %v445_v30  ;;  %v442_v31 = vsel %vm326_vm0, %v428_v29, -inf }
 0x300   :  { %443 = vmax.xlane.f32.xlu0 %v442_v31 }
 0x388   :  { %v441_v34 = vpop.xlane.xlu1 %440 }
 0x389   :  { %v449_v35 = vsub.f32 %v423_v19, %v441_v34  ;;  %v438_v36 = vpop.xlane.xlu0 %437 }
 0x38a   :  { %v448_v37 = vsub.f32 %v418_v21, %v438_v36 }
 0x38b   :  { %v454_v38 = vmul.f32 1.442695, %v449_v35 }
 0x38c   :  { %v452_v41 = vmul.f32 1.442695, %v448_v37  ;;  %v447_v42 = vpop.xlane.xlu1 %446 }
 0x38d   :  { %2254 = vpow2.f32 %v454_v38  ;;  %v451_v43 = vsub.f32 %v433_v27, %v447_v42  ;;  %v444_v44 = vpop.xlane.xlu0 %443 }
 0x38e   :  { %2256 = vpow2.f32 %v452_v41  ;;  %v450_v45 = vsub.f32 %v428_v29, %v444_v44 }
 0x38f   :  { %v458_v46 = vmul.f32 1.442695, %v451_v43 }
 0x390   :  { %v456_v47 = vmul.f32 1.442695, %v450_v45 }
 0x391   :  { %2258 = vpow2.f32 %v458_v46 }
 0x392   :  { %2260 = vpow2.f32 %v456_v47 }
 0x397   :  { %v2255_v48 = vpop.eup %2254 }
 0x398   :  { %v2257_v49 = vpop.eup %2256  ;;  %v463_v50 = vsel %vm326_vm0, %v2255_v48, 0.0 }
 0x399   :  { %464 = vadd.xlane.f32.xlu1 %v463_v50  ;;  %v460_v51 = vsel %vm326_vm0, %v2257_v49, 0.0 }
 0x39a   :  { %461 = vadd.xlane.f32.xlu0 %v460_v51 }
 0x39b   :  { %v2259_v52 = vpop.eup %2258 }
 0x39c   :  { %v2261_v53 = vpop.eup %2260  ;;  %v469_v54 = vsel %vm326_vm0, %v2259_v52, 0.0 }
 0x39d   :  { %470 = vadd.xlane.f32.xlu1 %v469_v54  ;;  %v466_v55 = vsel %vm326_vm0, %v2261_v53, 0.0 }
 0x39e   :  { %467 = vadd.xlane.f32.xlu0 %v466_v55 }
 0x3ae   :  { %2162 = vrot.lane.b32.xlu1 %v2591_v15, %s2331_s7 }
 0x3b2   :  { %2167 = vrot.lane.b32.xlu1 %v2577_v4, %s2332_s30 }
 0x3b4   :  { %2157 = vrot.lane.b32.xlu0 %v2577_v4, %s2331_s7 }
 0x3b6   :  { %577 = vrot.lane.b32.xlu1 %v2565_v33, %s2331_s7 }
 0x3b8   :  { %579 = vrot.lane.b32.xlu0 %v2569_v40, %s2331_s7 }
 0x3ba   :  { %2172 = vrot.lane.b32.xlu1 %v2591_v15, %s2332_s30 }
 0x3bc   :  { %581 = vrot.lane.b32.xlu0 %v2581_v6, %s2331_s7 }
 0x3be   :  { %583 = vrot.lane.b32.xlu1 %v2589_v12, %s2331_s7 }
 0x3c0   :  { %851 = vrot.lane.b32.xlu0 %v2565_v33, %s2332_s30 }
 0x3c2   :  { %853 = vrot.lane.b32.xlu1 %v2569_v40, %s2332_s30 }
 0x3c4   :  { %855 = vrot.lane.b32.xlu0 %v2581_v6, %s2332_s30 }
 0x3c6   :  { %857 = vrot.lane.b32.xlu1 %v2589_v12, %s2332_s30 }
 0x426   :  { %v465_v56 = vpop.xlane.xlu1 %464 }
 0x427   :  { %2262 = vrcp.f32 %v465_v56  ;;  %v462_v57 = vpop.xlane.xlu0 %461 }
 0x428   :  { %2264 = vrcp.f32 %v462_v57 }
 0x42a   :  { %v471_v32 = vpop.xlane.xlu1 %470 }
 0x42b   :  { %2266 = vrcp.f32 %v471_v32  ;;  %v468_v58 = vpop.xlane.xlu0 %467 }
 0x42c   :  { %2268 = vrcp.f32 %v468_v58 }
 0x42e   :  { %v2163_v59 = vpop.permute.xlu1 %2162 }
 0x42f   :  { %v2158_v60 = vpop.permute.xlu0 %2157  ;;  %v2165_v0 = vunpack.i.h.bf16 %v2163_v59  ;;  %v2164_v2 = vunpack.i.l.bf16 %v2163_v59 }
 0x430   :  { %v2160_v39 = vunpack.i.h.bf16 %v2158_v60  ;;  %v2159_v61 = vunpack.i.l.bf16 %v2158_v60 }
 0x431   :  { %v2263_v62 = vpop.eup %2262  ;;  %v2066_v14 = vpack.c.bf16 %v2165_v0, %v2164_v2 }
 0x432   :  { %v2265_v63 = vpop.eup %2264  ;;  %v2060_v3 = vpack.c.bf16 %v2160_v39, %v2159_v61  ;;  %v2168_v7 = vpop.permute.xlu1 %2167  ;;  %v477_v9 = vmul.f32 %v2263_v62, %v2255_v48 }
 0x433   :  { %v476_v8 = vmul.f32 %v2265_v63, %v2257_v49  ;;  %v2170_v21 = vunpack.i.h.bf16 %v2168_v7  ;;  %v2169_v23 = vunpack.i.l.bf16 %v2168_v7  ;;  %v580_v26 = vpop.permute.xlu0 %579 }
 0x434   :  { %2062 = vmatprep.subr.msk.bf16.mxu1 %vm2573_vm1, %v2060_v3 }
 0x435   :  { %v2267_v10 = vpop.eup %2266  ;;  %1848 = vmatprep.mubr.msk.f32.mxu1 %vm326_vm0, %v476_v8  ;;  %v2080_v25 = vpack.c.bf16 %v2170_v21, %v2169_v23 }
 0x436   :  { %v2269_v13 = vpop.eup %2268  ;;  %1849 = vmatmul.mubr.msk.f32.vlgmr.msra.gmra.mrb[4].mxu1 %vm326_vm0, %v477_v9  ;;  %v479_v19 = vmul.f32 %v2267_v10, %v2259_v52  ;;  %v578_v20 = vpop.permute.xlu1 %577 }
 0x437   :  { %2065 = vmatpush3.bf16.xpose.msk.msra.mxu1 %vm2573_vm1, %v2060_v3  ;;  %v478_v18 = vmul.f32 %v2269_v13, %v2261_v53  ;;  %v582_v30 = vpop.permute.xlu0 %581 }
 0x438   :  { %2068 = vmatprep.subr.msk.bf16.mxu1 %vm2573_vm1, %v2066_v14 }
 0x439   :  { %1851 = vmatprep.mubr.msk.f32.mxu1 %vm326_vm0, %v478_v18 }
 0x43a   :  { %1852 = vmatmul.mubr.msk.f32.gmra.mrb[6].mxu1 %vm326_vm0, %v479_v19  ;;  %v2173_v27 = vpop.permute.xlu1 %2172 }
 0x43b   :  { %1862 = vmatprep.mubr.msk.f32.mxu1 %vm326_vm0, %v578_v20  ;;  %v2175_v28 = vunpack.i.h.bf16 %v2173_v27  ;;  %v2174_v29 = vunpack.i.l.bf16 %v2173_v27  ;;  %v852_v35 = vpop.permute.xlu0 %851 }
 0x43d   :  { %v2086_v31 = vpack.c.bf16 %v2175_v28, %v2174_v29 }
 0x43e   :  { %v584_v34 = vpop.permute.xlu1 %583 }
 0x43f   :  { %2071 = vmatpush3.bf16.xpose.msk.msra.mxu1 %vm2573_vm1, %v2066_v14  ;;  %v856_v37 = vpop.permute.xlu0 %855 }
 0x440   :  { %2082 = vmatprep.subr.msk.bf16.mxu1 %vm2573_vm1, %v2080_v25 }
 0x442   :  { %v854_v36 = vpop.permute.xlu1 %853 }
 0x446   :  { %1863 = vmatmul.mubr.msk.f32.vlgmr.msra.gmra.mrb[8].mxu1 %vm326_vm0, %v580_v26  ;;  %v858_v38 = vpop.permute.xlu1 %857 }
 0x447   :  { %1865 = vmatprep.mubr.msk.f32.mxu1 %vm326_vm0, %v582_v30  ;;  %2085 = vmatpush3.bf16.xpose.msk.msra.mxu1 %vm2573_vm1, %v2080_v25 }
 0x448   :  { %2088 = vmatprep.subr.msk.bf16.mxu1 %vm2573_vm1, %v2086_v31 }
 0x44a   :  { %1866 = vmatmul.mubr.msk.f32.gmra.mrb[10].mxu1 %vm326_vm0, %v584_v34 }
 0x44b   :  { %1890 = vmatprep.mubr.msk.f32.mxu1 %vm326_vm0, %v852_v35 }
 0x44f   :  { %2091 = vmatpush3.bf16.xpose.msk.msra.mxu1 %vm2573_vm1, %v2086_v31 }
 0x456   :  { %1891 = vmatmul.mubr.msk.f32.vlgmr.msra.gmra.mrb[12].mxu1 %vm326_vm0, %v854_v36 }
 0x457   :  { %1893 = vmatprep.mubr.msk.f32.mxu1 %vm326_vm0, %v856_v37 }
 0x45a   :  { %1894 = vmatmul.mubr.msk.f32.gmra.mrb[14].mxu1 %vm326_vm0, %v858_v38 }
 0x509   :  { %v2687_v41 = vpop.f32.mrb[4].mxu1 }
 0x50a   :  { %v2689_v42 = vpop.f32.mrb[5].mxu1 }
 0x50d   :  { %v2691_v43 = vpop.f32.mrb[6].mxu1 }
 0x50e   :  { %v2693_v44 = vpop.f32.mrb[7].mxu1 }
 0x519   :  { %v1864_v45 = vpop.f32.mrb[8].mxu1 }
 0x51a   :  { %v675_v46 = vpop.f32.mrb[9].mxu1 }
 0x51d   :  { %v1867_v47 = vpop.f32.mrb[10].mxu1 }
 0x51e   :  { %v685_v48 = vpop.f32.mrb[11].mxu1 }
 0x51f   :  { %v2730_v25 = vadd.f32 %v685_v48, %v2624_v24 }
 0x529   :  { %v1892_v49 = vpop.f32.mrb[12].mxu1 }
 0x52a   :  { %v955_v50 = vadd.f32 %v1892_v49, %v2606_v16  ;;  %v949_v51 = vpop.f32.mrb[13].mxu1 }
 0x52b   :  { %v950_v52 = vadd.f32 %v949_v51, %v2611_v17 }
 0x52c   :  { %v971_v53 = vsel %vm326_vm0, %v955_v50, -inf }
 0x52d   :  { %972 = vmax.xlane.f32.xlu1 %v971_v53  ;;  %v1895_v54 = vpop.f32.mrb[14].mxu1  ;;  %v968_v55 = vsel %vm326_vm0, %v950_v52, -inf }
 0x52e   :  { %v959_v56 = vpop.f32.mrb[15].mxu1  ;;  %969 = vmax.xlane.f32.xlu0 %v968_v55  ;;  %v965_v32 = vadd.f32 %v1895_v54, %v2618_v22 }
 0x52f   :  { %v960_v57 = vadd.f32 %v959_v56, %v2624_v24 }
 0x530   :  { %v977_v59 = vsel %vm326_vm0, %v965_v32, -inf }
 0x531   :  { %v974_v58 = vsel %vm326_vm0, %v960_v57, -inf }
 0x532   :  { %975 = vmax.xlane.f32.xlu0 %v974_v58 }
 0x536   :  { %978 = vmax.xlane.f32.xlu0 %v977_v59 }
 0x5ba   :  { %v973_v60 = vpop.xlane.xlu1 %972 }
 0x5bb   :  { %v981_v39 = vsub.f32 %v955_v50, %v973_v60  ;;  %v970_v61 = vpop.xlane.xlu0 %969 }
 0x5bc   :  { %v980_v62 = vsub.f32 %v950_v52, %v970_v61 }
 0x5bd   :  { %v986_v63 = vmul.f32 1.442695, %v981_v39 }
 0x5be   :  { %v984_v0 = vmul.f32 1.442695, %v980_v62 }
 0x5bf   :  { %2270 = vpow2.f32 %v986_v63  ;;  %v976_v9 = vpop.xlane.xlu0 %975 }
 0x5c0   :  { %2272 = vpow2.f32 %v984_v0  ;;  %v982_v10 = vsub.f32 %v960_v57, %v976_v9 }
 0x5c2   :  { %v988_v13 = vmul.f32 1.442695, %v982_v10 }
 0x5c3   :  { %v979_v14 = vpop.xlane.xlu0 %978 }
 0x5c4   :  { %v983_v18 = vsub.f32 %v965_v32, %v979_v14  ;;  %2274 = vpow2.f32 %v988_v13 }
 0x5c6   :  { %v990_v19 = vmul.f32 1.442695, %v983_v18 }
 0x5c8   :  { %2276 = vpow2.f32 %v990_v19 }
 0x5c9   :  { %v2703_v2 = vpop.eup %2270 }
 0x5ca   :  { %v2273_v3 = vpop.eup %2272  ;;  %v995_v7 = vsel %vm326_vm0, %v2703_v2, 0.0 }
 0x5cb   :  { %996 = vadd.xlane.f32.xlu1 %v995_v7  ;;  %v992_v8 = vsel %vm326_vm0, %v2273_v3, 0.0 }
 0x5cc   :  { %993 = vadd.xlane.f32.xlu0 %v992_v8 }
 0x5ce   :  { %v2275_v20 = vpop.eup %2274 }
 0x5cf   :  { %v998_v21 = vsel %vm326_vm0, %v2275_v20, 0.0 }
 0x5d2   :  { %v2277_v23 = vpop.eup %2276 }
 0x5dc   :  { %2182 = vrot.lane.b32.xlu1 %v2587_v11, %s2332_s30 }
 0x5e0   :  { %2187 = vrot.lane.b32.xlu1 %v2577_v4, %s2333_s9  ;;  %v1001_v4 = vsel %vm326_vm0, %v2277_v23, 0.0 }
 0x5e2   :  { %2177 = vrot.lane.b32.xlu0 %v2579_v5, %s2332_s30 }
 0x5e4   :  { %2192 = vrot.lane.b32.xlu1 %v2591_v15, %s2333_s9  ;;  %v2727_v15 = vadd.f32 %v675_v46, %v2611_v17 }
 0x5e6   :  { %v694_v26 = vsel %vm326_vm0, %v2727_v15, -inf }
 0x601   :  { %999 = vadd.xlane.f32.xlu0 %v998_v21 }
 0x608   :  { %1002 = vadd.xlane.f32.xlu1 %v1001_v4 }
 0x617   :  { %1121 = vrot.lane.b32.xlu0 %v2565_v33, %s2333_s9  ;;  %v2735_v33 = vadd.f32 %v1864_v45, %v2606_v16 }
 0x619   :  { %1123 = vrot.lane.b32.xlu1 %v2569_v40, %s2333_s9  ;;  %v2738_v40 = vadd.f32 %v1867_v47, %v2618_v22 }
 0x61b   :  { %1125 = vrot.lane.b32.xlu0 %v2581_v6, %s2333_s9  ;;  %v700_v6 = vsel %vm326_vm0, %v2730_v25, -inf  ;;  %v703_v27 = vsel %vm326_vm0, %v2738_v40, -inf }
 0x61d   :  { %1127 = vrot.lane.b32.xlu1 %v2589_v12, %s2333_s9  ;;  %v697_v12 = vsel %vm326_vm0, %v2735_v33, -inf }
 0x63a   :  { %695 = vmax.xlane.f32.xlu0 %v694_v26 }
 0x63e   :  { %701 = vmax.xlane.f32.xlu0 %v700_v6 }
 0x641   :  { %698 = vmax.xlane.f32.xlu1 %v697_v12 }
 0x642   :  { %704 = vmax.xlane.f32.xlu0 %v703_v27 }
 0x658   :  { %v997_v28 = vpop.xlane.xlu1 %996 }
 0x659   :  { %v994_v29 = vpop.xlane.xlu0 %993 }
 0x65a   :  { %2278 = vrcp.f32 %v994_v29 }
 0x65b   :  { %2280 = vrcp.f32 %v997_v28 }
 0x65c   :  { %v2183_v30 = vpop.permute.xlu1 %2182 }
 0x65d   :  { %v2178_v31 = vpop.permute.xlu0 %2177  ;;  %v2185_v34 = vunpack.i.h.bf16 %v2183_v30  ;;  %v2184_v35 = vunpack.i.l.bf16 %v2183_v30 }
 0x65e   :  { %v2180_v36 = vunpack.i.h.bf16 %v2178_v31  ;;  %v2179_v37 = vunpack.i.l.bf16 %v2178_v31 }
 0x65f   :  { %v2096_v46 = vpack.c.bf16 %v2185_v34, %v2184_v35 }
 0x660   :  { %v2092_v38 = vpack.c.bf16 %v2180_v36, %v2179_v37  ;;  %v2188_v45 = vpop.permute.xlu1 %2187 }
 0x661   :  { %v2190_v47 = vunpack.i.h.bf16 %v2188_v45  ;;  %v2189_v48 = vunpack.i.l.bf16 %v2188_v45 }
 0x662   :  { %2093 = vmatprep.subr.bf16.mxu1 %v2092_v38 }
 0x663   :  { %2095 = vmatpush3.bf16.msra.mxu1 %v2092_v38  ;;  %v2100_v52 = vpack.c.bf16 %v2190_v47, %v2189_v48 }
 0x664   :  { %v2279_v49 = vpop.eup %2278  ;;  %2097 = vmatprep.subr.bf16.mxu1 %v2096_v46  ;;  %v2193_v54 = vpop.permute.xlu1 %2192 }
 0x665   :  { %v2281_v50 = vpop.eup %2280  ;;  %v1008_v51 = vmul.f32 %v2279_v49, %v2273_v3  ;;  %v2195_v55 = vunpack.i.h.bf16 %v2193_v54  ;;  %v2194_v56 = vunpack.i.l.bf16 %v2193_v54 }
 0x666   :  { %v1009_v53 = vmul.f32 %v2281_v50, %v2703_v2 }
 0x667   :  { %2099 = vmatpush3.bf16.msra.mxu1 %v2096_v46  ;;  %1904 = vmatprep.mubr.msk.f32.mxu1 %vm326_vm0, %v1008_v51  ;;  %v2106_v57 = vpack.c.bf16 %v2195_v55, %v2194_v56 }
 0x668   :  { %2102 = vmatprep.subr.msk.bf16.mxu1 %vm2573_vm1, %v2100_v52 }
 0x66a   :  { %1905 = vmatmul.mubr.msk.f32.vlgmr.msra.gmra.mrb[16].mxu1 %vm326_vm0, %v1009_v53 }
 0x670   :  { %2105 = vmatpush3.bf16.xpose.msk.msra.mxu1 %vm2573_vm1, %v2100_v52 }
 0x671   :  { %2108 = vmatprep.subr.msk.bf16.mxu1 %vm2573_vm1, %v2106_v57 }
 0x678   :  { %2111 = vmatpush3.bf16.xpose.msk.msra.mxu1 %vm2573_vm1, %v2106_v57 }
 0x68e   :  { %v1000_v32 = vpop.xlane.xlu0 %999 }
 0x68f   :  { %2282 = vrcp.f32 %v1000_v32 }
 0x692   :  { %v1122_v61 = vpop.permute.xlu0 %1121 }
 0x695   :  { %v1003_v58 = vpop.xlane.xlu1 %1002 }
 0x696   :  { %2284 = vrcp.f32 %v1003_v58  ;;  %v1126_v0 = vpop.permute.xlu0 %1125 }
 0x699   :  { %v2283_v59 = vpop.eup %2282  ;;  %v1124_v63 = vpop.permute.xlu1 %1123 }
 0x69a   :  { %v1010_v60 = vmul.f32 %v2283_v59, %v2275_v20 }
 0x69c   :  { %1907 = vmatprep.mubr.msk.f32.mxu1 %vm326_vm0, %v1010_v60 }
 0x69d   :  { %v1128_v1 = vpop.permute.xlu1 %1127 }
 0x6a0   :  { %v2285_v39 = vpop.eup %2284 }
 0x6a1   :  { %v1011_v62 = vmul.f32 %v2285_v39, %v2277_v23 }
 0x6a3   :  { %1908 = vmatmul.mubr.msk.f32.gmra.mrb[18].mxu1 %vm326_vm0, %v1011_v62 }
 0x6a4   :  { %1918 = vmatprep.mubr.msk.f32.mxu1 %vm326_vm0, %v1122_v61 }
 0x6a7   :  { %1919 = vmatmul.mubr.msk.f32.vlgmr.msra.gmra.mrb[20].mxu1 %vm326_vm0, %v1124_v63 }
 0x6a8   :  { %1921 = vmatprep.mubr.msk.f32.mxu1 %vm326_vm0, %v1126_v0 }
 0x6ab   :  { %1922 = vmatmul.mubr.msk.f32.gmra.mrb[22].mxu1 %vm326_vm0, %v1128_v1 }
 0x6c7   :  { %v696_v8 = vpop.xlane.xlu0 %695 }
 0x6c8   :  { %v706_v14 = vsub.f32 %v2727_v15, %v696_v8 }
 0x6ca   :  { %v710_v21 = vmul.f32 1.442695, %v706_v14 }
 0x6cb   :  { %v702_v9 = vpop.xlane.xlu0 %701 }
 0x6cc   :  { %v708_v23 = vsub.f32 %v2730_v25, %v702_v9 }
 0x6ce   :  { %v699_v10 = vpop.xlane.xlu1 %698 }
 0x6cf   :  { %v707_v13 = vsub.f32 %v2735_v33, %v699_v10  ;;  %v705_v18 = vpop.xlane.xlu0 %704  ;;  %v714_v33 = vmul.f32 1.442695, %v708_v23 }
 0x6d0   :  { %v709_v20 = vsub.f32 %v2738_v40, %v705_v18 }
 0x6d1   :  { %v712_v19 = vmul.f32 1.442695, %v707_v13 }
 0x6d2   :  { %v716_v6 = vmul.f32 1.442695, %v709_v20 }
 0x6d3   :  { %2286 = vpow2.f32 %v712_v19 }
 0x6d4   :  { %2288 = vpow2.f32 %v710_v21 }
 0x6d5   :  { %2290 = vpow2.f32 %v716_v6 }
 0x6d6   :  { %2292 = vpow2.f32 %v714_v33 }
 0x73d   :  { %v2763_v2 = vpop.f32.mrb[16].mxu1 }
 0x73e   :  { %v2765_v3 = vpop.f32.mrb[17].mxu1 }
 0x73f   :  { %v2221_v7 = vpack.i.bf16 %v2763_v2, %v2765_v3 }
 0x776   :  { %v2773_v4 = vpop.f32.mrb[18].mxu1 }
 0x777   :  { %v2775_v26 = vpop.f32.mrb[19].mxu1 }
 0x778   :  { %v2236_v12 = vpack.i.bf16 %v2773_v4, %v2775_v26 }
 0x77a   :  { %v1920_v27 = vpop.f32.mrb[20].mxu1 }
 0x77b   :  { %v1225_v15 = vadd.f32 %v1920_v27, %v2606_v16  ;;  %v1219_v28 = vpop.f32.mrb[21].mxu1  ;;  %v2786_v16 = vpop.eup %2286 }
 0x77c   :  { %v1220_v40 = vadd.f32 %v1219_v28, %v2611_v17  ;;  %v2289_v37 = vpop.eup %2288  ;;  %v721_v38 = vsel %vm326_vm0, %v2786_v16, 0.0 }
 0x77d   :  { %v1241_v25 = vsel %vm326_vm0, %v1225_v15, -inf  ;;  %v2791_v45 = vpop.eup %2290 }
 0x77e   :  { %1242 = vmax.xlane.f32.xlu1 %v1241_v25  ;;  %v1923_v29 = vpop.f32.mrb[22].mxu1  ;;  %v1238_v30 = vsel %vm326_vm0, %v1220_v40, -inf  ;;  %v2794_v46 = vpop.eup %2292 }
 0x77f   :  { %v1235_v31 = vadd.f32 %v1923_v29, %v2618_v22  ;;  %v1229_v34 = vpop.f32.mrb[23].mxu1  ;;  %1239 = vmax.xlane.f32.xlu0 %v1238_v30  ;;  %v718_v22 = vsel %vm326_vm0, %v2289_v37, 0.0  ;;  %v724_v47 = vsel %vm326_vm0, %v2794_v46, 0.0 }
 0x780   :  { %v1230_v35 = vadd.f32 %v1229_v34, %v2624_v24  ;;  %v727_v24 = vsel %vm326_vm0, %v2791_v45, 0.0 }
 0x781   :  { %v1247_v36 = vsel %vm326_vm0, %v1235_v31, -inf }
 0x782   :  { %1248 = vmax.xlane.f32.xlu1 %v1247_v36  ;;  %v1244_v17 = vsel %vm326_vm0, %v1230_v35, -inf }
 0x783   :  { %1245 = vmax.xlane.f32.xlu0 %v1244_v17 }
 0x786   :  { %722 = vadd.xlane.f32.xlu1 %v721_v38 }
 0x787   :  { %719 = vadd.xlane.f32.xlu0 %v718_v22 }
 0x78a   :  { %728 = vadd.xlane.f32.xlu1 %v727_v24 }
 0x78b   :  { %725 = vadd.xlane.f32.xlu0 %v724_v47 }
 0x80b   :  { %v1243_v48 = vpop.xlane.xlu1 %1242 }
 0x80c   :  { %v1251_v49 = vsub.f32 %v1225_v15, %v1243_v48  ;;  %v1240_v50 = vpop.xlane.xlu0 %1239 }
 0x80d   :  { %v1250_v51 = vsub.f32 %v1220_v40, %v1240_v50 }
 0x80e   :  { %v1256_v52 = vmul.f32 1.442695, %v1251_v49 }
 0x80f   :  { %v1254_v53 = vmul.f32 1.442695, %v1250_v51  ;;  %v1249_v54 = vpop.xlane.xlu1 %1248  ;;  %v1453_v51 = vld [vmem:[%s2950_s4] sm:$0xff] }
 0x810   :  { %2294 = vpow2.f32 %v1256_v52  ;;  %v1253_v55 = vsub.f32 %v1235_v31, %v1249_v54  ;;  %v1246_v56 = vpop.xlane.xlu0 %1245  ;;  %v1454_v52 = vld [vmem:[%s2950_s4 + $0x8] sm:$0xff] }
 0x811   :  { %2296 = vpow2.f32 %v1254_v53  ;;  %v1252_v57 = vsub.f32 %v1230_v35, %v1246_v56  ;;  %v1455_v53 = vld [vmem:[%s2950_s4 + $0x10] sm:$0xff]  ;;  %v2120_v54 = vpack.c.bf16 %v1454_v52, %v1453_v51 }
 0x812   :  { %v1260_v32 = vmul.f32 1.442695, %v1253_v55  ;;  %v1456_v55 = vld [vmem:[%s2950_s4 + $0x18] sm:$0xff] }
 0x813   :  { %v1258_v58 = vmul.f32 1.442695, %v1252_v57  ;;  %v723_v13 = vpop.xlane.xlu1 %722  ;;  %v2124_v56 = vpack.c.bf16 %v1456_v55, %v1455_v53  ;;  %v1457_v57 = vld [vmem:[%s2950_s4 + $0x20] sm:$0xff] }
 0x814   :  { %2298 = vpow2.f32 %v1260_v32  ;;  %v720_v59 = vpop.xlane.xlu0 %719  ;;  %v1458_v32 = vld [vmem:[%s2950_s4 + $0x28] sm:$0xff] }
 0x815   :  { %2300 = vpow2.f32 %v1258_v58  ;;  %v2128_v58 = vpack.c.bf16 %v1458_v32, %v1457_v57 }
 0x816   :  { %2302 = vrcp.f32 %v720_v59  ;;  %v1459_v59 = vld [vmem:[%s2950_s4 + $0x30] sm:$0xff] }
 0x817   :  { %v729_v14 = vpop.xlane.xlu1 %728  ;;  %2304 = vrcp.f32 %v723_v13 }
 0x818   :  { %v726_v18 = vpop.xlane.xlu0 %725 }
 0x819   :  { %2306 = vrcp.f32 %v726_v18  ;;  %v1468_v18 = vld [vmem:[%s2950_s4 + $0x78] sm:$0xff] }
 0x81a   :  { %v2800_v60 = vpop.eup %2294  ;;  %2308 = vrcp.f32 %v729_v14  ;;  %v1467_v14 = vld [vmem:[%s2950_s4 + $0x70] sm:$0xff] }
 0x81b   :  { %v2802_v39 = vpop.eup %2296  ;;  %v1265_v61 = vsel %vm326_vm0, %v2800_v60, 0.0 }
 0x81c   :  { %1266 = vadd.xlane.f32.xlu1 %v1265_v61  ;;  %v1262_v62 = vsel %vm326_vm0, %v2802_v39, 0.0  ;;  %v1461_v61 = vld [vmem:[%s2950_s4 + $0x40] sm:$0xff] }
 0x81d   :  { %1263 = vadd.xlane.f32.xlu0 %v1262_v62  ;;  %v1462_v62 = vld [vmem:[%s2950_s4 + $0x48] sm:$0xff] }
 0x81e   :  { %v2808_v63 = vpop.eup %2298 }
 0x81f   :  { %v2810_v0 = vpop.eup %2300  ;;  %v1271_v1 = vsel %vm326_vm0, %v2808_v63, 0.0 }
 0x820   :  { %1272 = vadd.xlane.f32.xlu1 %v1271_v1  ;;  %v1268_v8 = vsel %vm326_vm0, %v2810_v0, 0.0  ;;  %v2303_v9 = vpop.eup %2302  ;;  %v1464_v1 = vld [vmem:[%s2950_s4 + $0x58] sm:$0xff] }
 0x821   :  { %1269 = vadd.xlane.f32.xlu0 %v1268_v8  ;;  %v734_v10 = vmul.f32 %v2303_v9, %v2289_v37  ;;  %v2305_v29 = vpop.eup %2304  ;;  %v1465_v9 = vld [vmem:[%s2950_s4 + $0x60] sm:$0xff] }
 0x822   :  { %v735_v36 = vmul.f32 %v2305_v29, %v2786_v16 }
 0x823   :  { %1876 = vmatprep.mubr.msk.f32.mxu0 %vm326_vm0, %v734_v10  ;;  %v2307_v30 = vpop.eup %2306  ;;  %v1466_v10 = vld [vmem:[%s2950_s4 + $0x68] sm:$0xff] }
 0x824   :  { %v2309_v17 = vpop.eup %2308  ;;  %v736_v37 = vmul.f32 %v2307_v30, %v2794_v46  ;;  %v2144_v13 = vpack.c.bf16 %v1466_v10, %v1465_v9 }
 0x825   :  { %v737_v24 = vmul.f32 %v2309_v17, %v2791_v45 }
 0x831   :  { %2202 = vrot.lane.b32.xlu1 %v2587_v11, %s2331_s7 }
 0x835   :  { %2207 = vrot.lane.b32.xlu1 %v2579_v5, %s2333_s9 }
 0x837   :  { %2197 = vrot.lane.b32.xlu0 %v2579_v5, %s2331_s7 }
 0x839   :  { %2212 = vrot.lane.b32.xlu1 %v2587_v11, %s2333_s9 }
 0x83d   :  { %2222 = vrot.lane.b32.xlu1 %v2221_v7, %s2332_s30 }
 0x8a9   :  { %v1267_v19 = vpop.xlane.xlu1 %1266 }
 0x8aa   :  { %v1264_v20 = vpop.xlane.xlu0 %1263 }
 0x8ab   :  { %2310 = vrcp.f32 %v1264_v20 }
 0x8ac   :  { %2312 = vrcp.f32 %v1267_v19  ;;  %v2148_v19 = vpack.c.bf16 %v1468_v18, %v1467_v14 }
 0x8ad   :  { %v1273_v21 = vpop.xlane.xlu1 %1272 }
 0x8ae   :  { %v1270_v23 = vpop.xlane.xlu0 %1269 }
 0x8af   :  { %2314 = vrcp.f32 %v1270_v23 }
 0x8b0   :  { %2316 = vrcp.f32 %v1273_v21 }
 0x8b1   :  { %v2203_v6 = vpop.permute.xlu1 %2202 }
 0x8b2   :  { %v2198_v33 = vpop.permute.xlu0 %2197  ;;  %v2205_v5 = vunpack.i.h.bf16 %v2203_v6  ;;  %v2204_v27 = vunpack.i.l.bf16 %v2203_v6 }
 0x8b3   :  { %v2200_v15 = vunpack.i.h.bf16 %v2198_v33  ;;  %v2199_v11 = vunpack.i.l.bf16 %v2198_v33 }
 0x8b4   :  { %v2076_v3 = vpack.c.bf16 %v2205_v5, %v2204_v27 }
 0x8b5   :  { %v2072_v28 = vpack.c.bf16 %v2200_v15, %v2199_v11  ;;  %v2208_v2 = vpop.permute.xlu1 %2207  ;;  %v2311_v38 = vpop.eup %2310 }
 0x8b6   :  { %v2210_v7 = vunpack.i.h.bf16 %v2208_v2  ;;  %v2209_v40 = vunpack.i.l.bf16 %v2208_v2  ;;  %v2313_v47 = vpop.eup %2312  ;;  %v1278_v48 = vmul.f32 %v2311_v38, %v2802_v39 }
 0x8b7   :  { %2073 = vmatprep.subr.bf16.mxu0 %v2072_v28  ;;  %v1279_v16 = vmul.f32 %v2313_v47, %v2800_v60  ;;  %v1460_v60 = vld [vmem:[%s2950_s4 + $0x38] sm:$0xff] }
 0x8b8   :  { %2075 = vmatpush3.bf16.msra.mxu0 %v2072_v28  ;;  %v2112_v31 = vpack.c.bf16 %v2210_v7, %v2209_v40  ;;  %v2132_v39 = vpack.c.bf16 %v1460_v60, %v1459_v59  ;;  %v2328_v60 = vld [vmem:[%s2945_s0 + $0x10] sm:$0xff] }
 0x8b9   :  { %v2213_v25 = vpop.permute.xlu1 %2212  ;;  %2077 = vmatprep.subr.bf16.mxu0 %v2076_v3  ;;  %v2315_v49 = vpop.eup %2314 }
 0x8ba   :  { %v2215_v34 = vunpack.i.h.bf16 %v2213_v25  ;;  %v2214_v35 = vunpack.i.l.bf16 %v2213_v25  ;;  %v2317_v46 = vpop.eup %2316  ;;  %v1280_v50 = vmul.f32 %v2315_v49, %v2810_v0  ;;  %v1463_v0 = vld [vmem:[%s2950_s4 + $0x50] sm:$0xff] }
 0x8bb   :  { %v1281_v45 = vmul.f32 %v2317_v46, %v2808_v63  ;;  %v2136_v63 = vpack.c.bf16 %v1462_v62, %v1461_v61  ;;  %v2140_v8 = vpack.c.bf16 %v1464_v1, %v1463_v0  ;;  %v2329_v61 = vld [vmem:[%s2945_s0 + $0x18] sm:$0xff] }
 0x8bc   :  { %2079 = vmatpush3.bf16.msra.mxu0 %v2076_v3  ;;  %v2116_v22 = vpack.c.bf16 %v2215_v34, %v2214_v35 }
 0x8bd   :  { %2113 = vmatprep.subr.bf16.mxu0 %v2112_v31  ;;  %v2223_v40 = vpop.permute.xlu1 %2222 }
 0x8be   :  { %v2225_v35 = vunpack.i.h.bf16 %v2223_v40 }
 0x8bf   :  { %1877 = vmatmul.mubr.msk.f32.vlgmr.msra.gmra.mrb[12].mxu0 %vm326_vm0, %v735_v36  ;;  %v2224_v36 = vunpack.i.l.bf16 %v2223_v40 }
 0x8c0   :  { %1879 = vmatprep.mubr.msk.f32.mxu0 %vm326_vm0, %v736_v37  ;;  %2115 = vmatpush3.bf16.msra.mxu0 %v2112_v31 }
 0x8c1   :  { %2117 = vmatprep.subr.bf16.mxu0 %v2116_v22 }
 0x8c3   :  { %1880 = vmatmul.mubr.msk.f32.gmra.mrb[14].mxu0 %vm326_vm0, %v737_v24 }
 0x8c4   :  { %2119 = vmatpush3.bf16.msra.mxu0 %v2116_v22  ;;  %1932 = vmatprep.mubr.msk.f32.mxu0 %vm326_vm0, %v1278_v48 }
 0x8c5   :  { %2121 = vmatprep.subr.bf16.mxu0 %v2120_v54 }
 0x8c7   :  { %1933 = vmatmul.mubr.msk.f32.vlgmr.msra.gmra.mrb[16].mxu0 %vm326_vm0, %v1279_v16 }
 0x8c8   :  { %1935 = vmatprep.mubr.msk.f32.mxu0 %vm326_vm0, %v1280_v50  ;;  %2123 = vmatpush3.bf16.msra.mxu0 %v2120_v54 }
 0x8c9   :  { %2125 = vmatprep.subr.bf16.mxu0 %v2124_v56 }
 0x8cb   :  { %1936 = vmatmul.mubr.msk.f32.gmra.mrb[18].mxu0 %vm326_vm0, %v1281_v45 }
 0x8cc   :  { %2127 = vmatpush3.bf16.msra.mxu0 %v2124_v56  ;;  %v2326_v56 = vld [vmem:[%s2945_s0 + $0x8] sm:$0xff] }
 0x8cd   :  { %2129 = vmatprep.subr.bf16.mxu0 %v2128_v58 }
 0x8d0   :  { %2131 = vmatpush3.bf16.msra.mxu0 %v2128_v58 }
 0x8d1   :  { %2133 = vmatprep.subr.bf16.mxu0 %v2132_v39 }
 0x8d4   :  { %2135 = vmatpush3.bf16.msra.mxu0 %v2132_v39 }
 0x8d5   :  { %2137 = vmatprep.subr.bf16.mxu0 %v2136_v63 }
 0x8d8   :  { %2139 = vmatpush3.bf16.msra.mxu0 %v2136_v63 }
 0x8d9   :  { %2141 = vmatprep.subr.bf16.mxu0 %v2140_v8 }
 0x8dc   :  { %2143 = vmatpush3.bf16.msra.mxu0 %v2140_v8 }
 0x8dd   :  { %2145 = vmatprep.subr.bf16.mxu0 %v2144_v13 }
 0x8e0   :  { %2147 = vmatpush3.bf16.msra.mxu0 %v2144_v13 }
 0x8e1   :  { %2149 = vmatprep.subr.bf16.mxu0 %v2148_v19 }
 0x8e4   :  { %2151 = vmatpush3.bf16.msra.mxu0 %v2148_v19 }
 0x992   :  { %v1878_v20 = vpop.f32.mrb[12].mxu0 }
 0x993   :  { %v832_v21 = vpop.f32.mrb[13].mxu0 }
 0x994   :  { %v2216_v23 = vpack.i.bf16 %v1878_v20, %v832_v21 }
 0x996   :  { %2217 = vrot.lane.b32.xlu0 %v2216_v23, %s2333_s9  ;;  %v1881_v6 = vpop.f32.mrb[14].mxu0 }
 0x997   :  { %v842_v33 = vpop.f32.mrb[15].mxu0 }
 0x998   :  { %v2226_v5 = vpack.i.bf16 %v1881_v6, %v842_v33 }
 0x99a   :  { %2227 = vrot.lane.b32.xlu1 %v2226_v5, %s2333_s9  ;;  %v1934_v27 = vpop.f32.mrb[16].mxu0 }
 0x99b   :  { %v1372_v15 = vpop.f32.mrb[17].mxu0 }
 0x99c   :  { %v2231_v11 = vpack.i.bf16 %v1934_v27, %v1372_v15 }
 0x99e   :  { %2232 = vrot.lane.b32.xlu0 %v2231_v11, %s2331_s7  ;;  %v1937_v28 = vpop.f32.mrb[18].mxu0 }
 0x99f   :  { %v1382_v2 = vpop.f32.mrb[19].mxu0 }
 0x9a0   :  { %v2241_v3 = vpack.i.bf16 %v1937_v28, %v1382_v2 }
 0x9a2   :  { %2237 = vrot.lane.b32.xlu0 %v2236_v12, %s2332_s30  ;;  %2242 = vrot.lane.b32.xlu1 %v2241_v3, %s2331_s7 }
 0xa08   :  { %v2218_v7 = vpop.permute.xlu0 %2217 }
 0xa09   :  { %v2220_v25 = vunpack.i.h.bf16 %v2218_v7  ;;  %v2219_v29 = vunpack.i.l.bf16 %v2218_v7 }
 0xa0b   :  { %v1440_v30 = vsel %vm326_vm0, %v2687_v41, %v2220_v25  ;;  %v1439_v34 = vsel %vm326_vm0, %v2689_v42, %v2219_v29 }
 0xa0c   :  { %v2228_v31 = vpop.permute.xlu1 %2227  ;;  %v1444_v38 = vsel %vm1443_vm2, %v1439_v34, %v2224_v36  ;;  %v1445_v22 = vsel %vm1443_vm2, %v1440_v30, %v2225_v35  ;;  %v1682_v35 = vld [vmem:[%s2951_s5] ss:$0 sm:$0xff] }
 0xa0d   :  { %v2230_v12 = vunpack.i.h.bf16 %v2228_v31  ;;  %v2229_v37 = vunpack.i.l.bf16 %v2228_v31 }
 0xa0f   :  { %v1441_v50 = vsel %vm326_vm0, %v2693_v44, %v2229_v37  ;;  %v1442_v45 = vsel %vm326_vm0, %v2691_v43, %v2230_v12  ;;  %v2327_v43 = vld [vmem:[%s2945_s0] sm:$0xff] }
 0xa10   :  { %v2233_v17 = vpop.permute.xlu0 %2232 }
 0xa11   :  { %v2235_v4 = vunpack.i.h.bf16 %v2233_v17  ;;  %v2234_v26 = vunpack.i.l.bf16 %v2233_v17 }
 0xa13   :  { %v1449_v24 = vsel %vm1448_vm3, %v1444_v38, %v2234_v26  ;;  %v1450_v41 = vsel %vm1448_vm3, %v1445_v22, %v2235_v4  ;;  %v1683_v4 = vld [vmem:[%s2952_s6] ss:$0 sm:$0xff] }
 0xa14   :  { %v2238_v47 = vpop.permute.xlu0 %2237  ;;  %1970 = vmatprep.mubr.f32.mxu0 %v1449_v24  ;;  %v2243_v42 = vpop.permute.xlu1 %2242 }
 0xa15   :  { %v2240_v48 = vunpack.i.h.bf16 %v2238_v47  ;;  %v2239_v49 = vunpack.i.l.bf16 %v2238_v47  ;;  %v2245_v16 = vunpack.i.h.bf16 %v2243_v42  ;;  %v2244_v46 = vunpack.i.l.bf16 %v2243_v42  ;;  %1971 = vmatmul.mubr.f32.vlgmr.msra.gmra.mrb[20].mxu0 %v1450_v41 }
 0xa17   :  { %v1446_v51 = vsel %vm1443_vm2, %v1441_v50, %v2239_v49  ;;  %v1447_v52 = vsel %vm1443_vm2, %v1442_v45, %v2240_v48 }
 0xa18   :  { %v1451_v53 = vsel %vm1448_vm3, %v1446_v51, %v2244_v46  ;;  %v1452_v54 = vsel %vm1448_vm3, %v1447_v52, %v2245_v16 }
 0xa19   :  { %1973 = vmatprep.mubr.f32.mxu0 %v1451_v53 }
 0xa1a   :  { %1974 = vmatmul.mubr.f32.gmra.mrb[22].mxu0 %v1452_v54 }
 0xae8   :  { %v1972_v55 = vpop.f32.mrb[20].mxu0 }
 0xae9   :  { %v1555_v57 = vadd.f32 %v2326_v56, %v1972_v55  ;;  %v1535_v44 = vpop.f32.mrb[21].mxu0 }
 0xaea   :  { %v1554_v32 = vadd.f32 %v2327_v43, %v1535_v44 }
 0xaeb   :  { %1560 = vadd.xlane.f32.xlu1 %v1555_v57 }
 0xaec   :  { %1558 = vadd.xlane.f32.xlu0 %v1554_v32 }
 0xaed   :  { %v1975_v58 = vpop.f32.mrb[22].mxu0 }
 0xaee   :  { %v1545_v59 = vpop.f32.mrb[23].mxu0  ;;  %v1557_v62 = vadd.f32 %v2329_v61, %v1975_v58 }
 0xaef   :  { %v1556_v39 = vadd.f32 %v2328_v60, %v1545_v59 }
 0xaf1   :  { %1562 = vadd.xlane.f32.xlu0 %v1556_v39 }
 0xaf5   :  { %1564 = vadd.xlane.f32.xlu0 %v1557_v62 }
 0xb78   :  { %v1561_v63 = vpop.xlane.xlu1 %1560 }
 0xb79   :  { %v1567_v0 = vmul.f32 0.0078125, %v1561_v63  ;;  %v1559_v1 = vpop.xlane.xlu0 %1558 }
 0xb7a   :  { %v1566_v8 = vmul.f32 0.0078125, %v1559_v1 }
 0xb7b   :  { %v1571_v9 = vsub.f32 %v1555_v57, %v1567_v0 }
 0xb7c   :  { %v1570_v10 = vsub.f32 %v1554_v32, %v1566_v8 }
 0xb7d   :  { %v1575_v13 = vmul.f32 %v1571_v9, %v1571_v9 }
 0xb7e   :  { %v1563_v14 = vpop.xlane.xlu0 %1562  ;;  %v1574_v18 = vmul.f32 %v1570_v10, %v1570_v10 }
 0xb7f   :  { %v1568_v19 = vmul.f32 0.0078125, %v1563_v14  ;;  %1580 = vadd.xlane.f32.xlu1 %v1575_v13 }
 0xb80   :  { %1578 = vadd.xlane.f32.xlu0 %v1574_v18 }
 0xb81   :  { %v1572_v20 = vsub.f32 %v1556_v39, %v1568_v19 }
 0xb82   :  { %v1565_v21 = vpop.xlane.xlu0 %1564 }
 0xb83   :  { %v1569_v23 = vmul.f32 0.0078125, %v1565_v21  ;;  %v1576_v6 = vmul.f32 %v1572_v20, %v1572_v20 }
 0xb85   :  { %v1573_v33 = vsub.f32 %v1557_v62, %v1569_v23  ;;  %1582 = vadd.xlane.f32.xlu0 %v1576_v6 }
 0xb87   :  { %v1577_v5 = vmul.f32 %v1573_v33, %v1573_v33 }
 0xb89   :  { %1584 = vadd.xlane.f32.xlu1 %v1577_v5 }
 0xc0c   :  { %v1581_v27 = vpop.xlane.xlu1 %1580 }
 0xc0d   :  { %v1587_v15 = vmul.f32 0.0078125, %v1581_v27  ;;  %v1579_v11 = vpop.xlane.xlu0 %1578 }
 0xc0e   :  { %v1586_v28 = vmul.f32 0.0078125, %v1579_v11 }
 0xc0f   :  { %v1591_v2 = vadd.f32 1e-05, %v1587_v15 }
 0xc10   :  { %v1590_v3 = vadd.f32 1e-05, %v1586_v28 }
 0xc11   :  { %2318 = vrsqrt.f32 %v1591_v2 }
 0xc12   :  { %2320 = vrsqrt.f32 %v1590_v3  ;;  %v1583_v7 = vpop.xlane.xlu0 %1582 }
 0xc13   :  { %v1588_v40 = vmul.f32 0.0078125, %v1583_v7 }
 0xc15   :  { %v1592_v25 = vadd.f32 1e-05, %v1588_v40 }
 0xc16   :  { %v1585_v29 = vpop.xlane.xlu1 %1584 }
 0xc17   :  { %2322 = vrsqrt.f32 %v1592_v25  ;;  %v1589_v30 = vmul.f32 0.0078125, %v1585_v29 }
 0xc19   :  { %v1593_v31 = vadd.f32 1e-05, %v1589_v30 }
 0xc1b   :  { %v2319_v34 = vpop.eup %2318  ;;  %2324 = vrsqrt.f32 %v1593_v31 }
 0xc1c   :  { %v2321_v36 = vpop.eup %2320  ;;  %v1599_v17 = vmul.f32 %v2319_v34, %v1571_v9 }
 0xc1d   :  { %v1598_v26 = vmul.f32 %v2321_v36, %v1570_v10 }
 0xc1e   :  { %v1610_v12 = vmul.f32 %v1682_v35, %v1599_v17 }
 0xc1f   :  { %v1609_v37 = vmul.f32 %v1682_v35, %v1598_v26 }
 0xc20   :  { %v1621_v38 = vadd.f32 %v1683_v4, %v1610_v12 }
 0xc21   :  { %v2323_v22 = vpop.eup %2322  ;;  %v1620_v24 = vadd.f32 %v1683_v4, %v1609_v37 }
 0xc22   :  { %1625 = vst [vmem:[%s2953_s8 + $0x8] sm:$0xff] %v1621_v38  ;;  %v1600_v41 = vmul.f32 %v2323_v22, %v1572_v20 }
 0xc23   :  { %1624 = vst [vmem:[%s2953_s8] sm:$0xff] %v1620_v24 }
 0xc24   :  { %v1611_v47 = vmul.f32 %v1682_v35, %v1600_v41 }
 0xc25   :  { %v2325_v42 = vpop.eup %2324 }
 0xc26   :  { %v1622_v48 = vadd.f32 %v1683_v4, %v1611_v47  ;;  %v1601_v49 = vmul.f32 %v2325_v42, %v1573_v33 }
 0xc28   :  { %1626 = vst [vmem:[%s2953_s8 + $0x10] sm:$0xff] %v1622_v48  ;;  %v1612_v16 = vmul.f32 %v1682_v35, %v1601_v49 }
 0xc2a   :  { %v1623_v46 = vadd.f32 %v1683_v4, %v1612_v16 }
 0xc2c   :  { %1627 = vst [vmem:[%s2953_s8 + $0x18] sm:$0xff] %v1623_v46 }

// kernel: cbformer_forward.3
= control target key start
LH: loop header
LB: loop body
LE: loop exit
PB: predicated region body
PF: predicated region fallthrough
CT: control target
= control target key end

     0   :  { %v1038_v0 = vmov 0.0|0.0   ;;  %vm75_vm0 = vcmask 261120   ;;  %s1591_s2 = inlined_call_operand.vmem [shape: f32[5,160,128], index: 2, kind: input, shape index: {}]   ;;  %s1592_s1 = inlined_call_operand.vmem [shape: f32[5,32,160], index: 1, kind: input, shape index: {}]   ;;  %s1593_s3 = inlined_call_operand.vmem [shape: f32[1,128], index: 3, kind: input, shape index: {}]   ;;  %s1594_s0 = inlined_call_operand.vmem [shape: f32[32,128], index: 0, kind: input, shape index: {}]   ;;  %s1595_s4 = inlined_call_operand.vmem [shape: f32[32,128], index: 4, kind: output, shape index: {}]  }
   0x1   :  { %859 = vmatprep.subr.bf16.mxu0 %v1038_v0  ;;  %889 = vmatprep.subr.bf16.mxu1 %v1038_v0  ;;  %v734_v1 = vld [vmem:[%s1591_s2 + $0xa0] sm:$0xff]  ;;  %v735_v2 = vld [vmem:[%s1591_s2 + $0xa8] sm:$0xff]  ;;  %v736_v6 = vld [vmem:[%s1591_s2 + $0xb0] sm:$0xff] }
   0x2   :  { %v25_v3 = vld [vmem:[%s1591_s2] sm:$0xff]  ;;  %v860_v4 = vpack.c.bf16 %v735_v2, %v734_v1  ;;  %v26_v5 = vld [vmem:[%s1591_s2 + $0x8] sm:$0xff]  ;;  %v737_v7 = vld [vmem:[%s1591_s2 + $0xb8] sm:$0xff] }
   0x3   :  { %v890_v8 = vpack.c.bf16 %v26_v5, %v25_v3  ;;  %v27_v9 = vld [vmem:[%s1591_s2 + $0x10] sm:$0xff]  ;;  %v28_v10 = vld [vmem:[%s1591_s2 + $0x18] sm:$0xff]  ;;  %v863_v11 = vpack.c.bf16 %v737_v7, %v736_v6  ;;  %v738_v13 = vld [vmem:[%s1591_s2 + $0xc0] sm:$0xff] }
   0x4   :  { %861 = vmatpush1.bf16.msra.mxu0 %v860_v4  ;;  %v893_v12 = vpack.c.bf16 %v28_v10, %v27_v9  ;;  %v739_v14 = vld [vmem:[%s1591_s2 + $0xc8] sm:$0xff]  ;;  %v29_v15 = vld [vmem:[%s1591_s2 + $0x20] sm:$0xff]  ;;  %v740_v19 = vld [vmem:[%s1591_s2 + $0xd0] sm:$0xff] }
   0x5   :  { %891 = vmatpush1.bf16.msra.mxu1 %v890_v8  ;;  %862 = vmatprep.subr.bf16.mxu0 %v1038_v0  ;;  %v30_v16 = vld [vmem:[%s1591_s2 + $0x28] sm:$0xff]  ;;  %v866_v17 = vpack.c.bf16 %v739_v14, %v738_v13  ;;  %v741_v20 = vld [vmem:[%s1591_s2 + $0xd8] sm:$0xff]  ;;  %v31_v21 = vld [vmem:[%s1591_s2 + $0x30] sm:$0xff] }
   0x6   :  { %892 = vmatprep.subr.bf16.mxu1 %v1038_v0  ;;  %v896_v18 = vpack.c.bf16 %v30_v16, %v29_v15  ;;  %v32_v22 = vld [vmem:[%s1591_s2 + $0x38] sm:$0xff]  ;;  %v869_v23 = vpack.c.bf16 %v741_v20, %v740_v19  ;;  %v742_v25 = vld [vmem:[%s1591_s2 + $0xe0] sm:$0xff]  ;;  %v743_v26 = vld [vmem:[%s1591_s2 + $0xe8] sm:$0xff] }
   0x7   :  { %v899_v24 = vpack.c.bf16 %v32_v22, %v31_v21  ;;  %v33_v27 = vld [vmem:[%s1591_s2 + $0x40] sm:$0xff]  ;;  %v34_v28 = vld [vmem:[%s1591_s2 + $0x48] sm:$0xff]  ;;  %v872_v31 = vpack.c.bf16 %v743_v26, %v742_v25  ;;  %v744_v33 = vld [vmem:[%s1591_s2 + $0xf0] sm:$0xff] }
   0x8   :  { %864 = vmatpush1.bf16.msra.mxu0 %v863_v11  ;;  %v727_v29 = vld [vmem:[%s1592_s1 + $0x48] sm:$0xff]  ;;  %v902_v32 = vpack.c.bf16 %v34_v28, %v33_v27  ;;  %v745_v34 = vld [vmem:[%s1591_s2 + $0xf8] sm:$0xff]  ;;  %v35_v35 = vld [vmem:[%s1591_s2 + $0x50] sm:$0xff] }
   0x9   :  { %894 = vmatpush1.bf16.msra.mxu1 %v893_v12  ;;  %865 = vmatprep.subr.bf16.mxu0 %v1038_v0  ;;  %v18_v30 = vld [vmem:[%s1592_s1 + $0x8] sm:$0xff]  ;;  %v36_v36 = vld [vmem:[%s1591_s2 + $0x58] sm:$0xff]  ;;  %v875_v37 = vpack.c.bf16 %v745_v34, %v744_v33  ;;  %v746_v39 = vld [vmem:[%s1591_s2 + $0x100] sm:$0xff] }
   0xa   :  { %895 = vmatprep.subr.bf16.mxu1 %v1038_v0  ;;  %754 = vmatprep.mubr.msk.f32.mxu0 %vm75_vm0, %v727_v29  ;;  %v905_v38 = vpack.c.bf16 %v36_v36, %v35_v35  ;;  %v747_v40 = vld [vmem:[%s1591_s2 + $0x108] sm:$0xff]  ;;  %v37_v41 = vld [vmem:[%s1591_s2 + $0x60] sm:$0xff]  ;;  %v748_v45 = vld [vmem:[%s1591_s2 + $0x110] sm:$0xff] }
   0xb   :  { %758 = vmatprep.mubr.msk.f32.mxu1 %vm75_vm0, %v18_v30  ;;  %v38_v42 = vld [vmem:[%s1591_s2 + $0x68] sm:$0xff]  ;;  %v878_v43 = vpack.c.bf16 %v747_v40, %v746_v39  ;;  %v749_v46 = vld [vmem:[%s1591_s2 + $0x118] sm:$0xff]  ;;  %v39_v47 = vld [vmem:[%s1591_s2 + $0x70] sm:$0xff] }
   0xc   :  { %867 = vmatpush1.bf16.msra.mxu0 %v866_v17  ;;  %v908_v44 = vpack.c.bf16 %v38_v42, %v37_v41  ;;  %v40_v48 = vld [vmem:[%s1591_s2 + $0x78] sm:$0xff]  ;;  %v881_v49 = vpack.c.bf16 %v749_v46, %v748_v45  ;;  %v750_v51 = vld [vmem:[%s1591_s2 + $0x120] sm:$0xff]  ;;  %v751_v52 = vld [vmem:[%s1591_s2 + $0x128] sm:$0xff] }
   0xd   :  { %897 = vmatpush1.bf16.msra.mxu1 %v896_v18  ;;  %868 = vmatprep.subr.bf16.mxu0 %v1038_v0  ;;  %v911_v50 = vpack.c.bf16 %v40_v48, %v39_v47  ;;  %v41_v53 = vld [vmem:[%s1591_s2 + $0x80] sm:$0xff]  ;;  %v42_v54 = vld [vmem:[%s1591_s2 + $0x88] sm:$0xff]  ;;  %v884_v55 = vpack.c.bf16 %v751_v52, %v750_v51  ;;  %v752_v57 = vld [vmem:[%s1591_s2 + $0x130] sm:$0xff] }
   0xe   :  { %898 = vmatprep.subr.bf16.mxu1 %v1038_v0  ;;  %v914_v56 = vpack.c.bf16 %v42_v54, %v41_v53  ;;  %v753_v58 = vld [vmem:[%s1591_s2 + $0x138] sm:$0xff]  ;;  %v43_v59 = vld [vmem:[%s1591_s2 + $0x90] sm:$0xff]  ;;  %v770_v63 = vld [vmem:[%s1591_s2 + $0x140] sm:$0xff] }
   0xf   :  { %v44_v60 = vld [vmem:[%s1591_s2 + $0x98] sm:$0xff]  ;;  %v887_v61 = vpack.c.bf16 %v753_v58, %v752_v57  ;;  %v771_v1 = vld [vmem:[%s1591_s2 + $0x148] sm:$0xff]  ;;  %v802_v2 = vld [vmem:[%s1591_s2 + $0x1e0] sm:$0xff] }
  0x10   :  { %870 = vmatpush1.bf16.msra.mxu0 %v869_v23  ;;  %v917_v62 = vpack.c.bf16 %v44_v60, %v43_v59  ;;  %v803_v3 = vld [vmem:[%s1591_s2 + $0x1e8] sm:$0xff]  ;;  %v726_v4 = vld [vmem:[%s1592_s1 + $0x40] sm:$0xff]  ;;  %v920_v5 = vpack.c.bf16 %v771_v1, %v770_v63  ;;  %v772_v8 = vld [vmem:[%s1591_s2 + $0x150] sm:$0xff] }
  0x11   :  { %900 = vmatpush1.bf16.msra.mxu1 %v899_v24  ;;  %871 = vmatprep.subr.bf16.mxu0 %v1038_v0  ;;  %v17_v6 = vld [vmem:[%s1592_s1] sm:$0xff]  ;;  %v950_v7 = vpack.c.bf16 %v803_v3, %v802_v2  ;;  %v773_v9 = vld [vmem:[%s1591_s2 + $0x158] sm:$0xff]  ;;  %v804_v10 = vld [vmem:[%s1591_s2 + $0x1f0] sm:$0xff] }
  0x12   :  { %901 = vmatprep.subr.bf16.mxu1 %v1038_v0  ;;  %v805_v11 = vld [vmem:[%s1591_s2 + $0x1f8] sm:$0xff]  ;;  %v923_v13 = vpack.c.bf16 %v773_v9, %v772_v8  ;;  %v728_v15 = vld [vmem:[%s1592_s1 + $0x50] sm:$0xff]  ;;  %v774_v17 = vld [vmem:[%s1591_s2 + $0x160] sm:$0xff] }
  0x13   :  { %v729_v12 = vld [vmem:[%s1592_s1 + $0x58] sm:$0xff]  ;;  %v953_v16 = vpack.c.bf16 %v805_v11, %v804_v10  ;;  %v775_v18 = vld [vmem:[%s1591_s2 + $0x168] sm:$0xff]  ;;  %v19_v19 = vld [vmem:[%s1592_s1 + $0x10] sm:$0xff] }
  0x14   :  { %873 = vmatpush1.bf16.msra.mxu0 %v872_v31  ;;  %v20_v14 = vld [vmem:[%s1592_s1 + $0x18] sm:$0xff]  ;;  %v806_v20 = vld [vmem:[%s1591_s2 + $0x200] sm:$0xff]  ;;  %v807_v21 = vld [vmem:[%s1591_s2 + $0x208] sm:$0xff]  ;;  %v926_v23 = vpack.c.bf16 %v775_v18, %v774_v17 }
  0x15   :  { %903 = vmatpush1.bf16.msra.mxu1 %v902_v32  ;;  %874 = vmatprep.subr.bf16.mxu0 %v1038_v0  ;;  %v731_v22 = vld [vmem:[%s1592_s1 + $0x68] sm:$0xff]  ;;  %v730_v25 = vld [vmem:[%s1592_s1 + $0x60] sm:$0xff]  ;;  %v956_v26 = vpack.c.bf16 %v807_v21, %v806_v20  ;;  %v776_v27 = vld [vmem:[%s1591_s2 + $0x170] sm:$0xff] }
  0x16   :  { %904 = vmatprep.subr.bf16.mxu1 %v1038_v0  ;;  %v22_v24 = vld [vmem:[%s1592_s1 + $0x28] sm:$0xff]  ;;  %v777_v28 = vld [vmem:[%s1591_s2 + $0x178] sm:$0xff]  ;;  %v21_v29 = vld [vmem:[%s1592_s1 + $0x20] sm:$0xff] }
  0x17   :  { %v808_v30 = vld [vmem:[%s1591_s2 + $0x210] sm:$0xff]  ;;  %v809_v31 = vld [vmem:[%s1591_s2 + $0x218] sm:$0xff]  ;;  %v929_v33 = vpack.c.bf16 %v777_v28, %v776_v27  ;;  %v810_v40 = vld [vmem:[%s1591_s2 + $0x220] sm:$0xff] }
  0x18   :  { %876 = vmatpush1.bf16.msra.mxu0 %v875_v37  ;;  %v733_v32 = vld [vmem:[%s1592_s1 + $0x78] sm:$0xff]  ;;  %v732_v35 = vld [vmem:[%s1592_s1 + $0x70] sm:$0xff]  ;;  %v959_v36 = vpack.c.bf16 %v809_v31, %v808_v30  ;;  %v778_v37 = vld [vmem:[%s1591_s2 + $0x180] sm:$0xff] }
  0x19   :  { %906 = vmatpush1.bf16.msra.mxu1 %v905_v38  ;;  %877 = vmatprep.subr.bf16.mxu0 %v1038_v0  ;;  %v24_v34 = vld [vmem:[%s1592_s1 + $0x38] sm:$0xff]  ;;  %v779_v38 = vld [vmem:[%s1591_s2 + $0x188] sm:$0xff]  ;;  %v23_v39 = vld [vmem:[%s1592_s1 + $0x30] sm:$0xff] }
  0x1a   :  { %907 = vmatprep.subr.bf16.mxu1 %v1038_v0  ;;  %v811_v41 = vld [vmem:[%s1591_s2 + $0x228] sm:$0xff]  ;;  %v780_v46 = vld [vmem:[%s1591_s2 + $0x190] sm:$0xff]  ;;  %v781_v47 = vld [vmem:[%s1591_s2 + $0x198] sm:$0xff] }
  0x1b   :  { %v763_v42 = vld [vmem:[%s1592_s1 + $0x88] sm:$0xff]  ;;  %v962_v45 = vpack.c.bf16 %v811_v41, %v810_v40  ;;  %v812_v48 = vld [vmem:[%s1591_s2 + $0x230] sm:$0xff]  ;;  %v782_v52 = vld [vmem:[%s1591_s2 + $0x1a0] sm:$0xff] }
  0x1c   :  { %879 = vmatpush1.bf16.msra.mxu0 %v878_v43  ;;  %v932_v43 = vpack.c.bf16 %v779_v38, %v778_v37  ;;  %v783_v53 = vld [vmem:[%s1591_s2 + $0x1a8] sm:$0xff]  ;;  %v814_v54 = vld [vmem:[%s1591_s2 + $0x240] sm:$0xff]  ;;  %v784_v58 = vld [vmem:[%s1591_s2 + $0x1b0] sm:$0xff] }
  0x1d   :  { %909 = vmatpush1.bf16.msra.mxu1 %v908_v44  ;;  %880 = vmatprep.subr.bf16.mxu0 %v1038_v0  ;;  %v795_v44 = vld [vmem:[%s1592_s1 + $0xc8] sm:$0xff]  ;;  %v785_v59 = vld [vmem:[%s1591_s2 + $0x1b8] sm:$0xff]  ;;  %v816_v60 = vld [vmem:[%s1591_s2 + $0x250] sm:$0xff] }
  0x1e   :  { %910 = vmatprep.subr.bf16.mxu1 %v1038_v0  ;;  %v786_v1 = vld [vmem:[%s1591_s2 + $0x1c0] sm:$0xff]  ;;  %v787_v2 = vld [vmem:[%s1591_s2 + $0x1c8] sm:$0xff]  ;;  %v789_v8 = vld [vmem:[%s1591_s2 + $0x1d8] sm:$0xff] }
  0x1f   :  { %v818_v3 = vld [vmem:[%s1591_s2 + $0x260] sm:$0xff]  ;;  %v820_v9 = vld [vmem:[%s1591_s2 + $0x270] sm:$0xff]  ;;  %v821_v10 = vld [vmem:[%s1591_s2 + $0x278] sm:$0xff] }
  0x20   :  { %882 = vmatpush1.bf16.msra.mxu0 %v881_v49  ;;  %v813_v49 = vld [vmem:[%s1591_s2 + $0x238] sm:$0xff]  ;;  %v794_v17 = vld [vmem:[%s1592_s1 + $0xc0] sm:$0xff]  ;;  %v836_v18 = vld [vmem:[%s1591_s2 + $0x290] sm:$0xff] }
  0x21   :  { %912 = vmatpush1.bf16.msra.mxu1 %v911_v50  ;;  %883 = vmatprep.subr.bf16.mxu0 %v1038_v0  ;;  %v935_v50 = vpack.c.bf16 %v781_v47, %v780_v46  ;;  %v965_v51 = vpack.c.bf16 %v813_v49, %v812_v48  ;;  %v765_v20 = vld [vmem:[%s1592_s1 + $0x98] sm:$0xff]  ;;  %v764_v21 = vld [vmem:[%s1592_s1 + $0x90] sm:$0xff]  ;;  %v767_v27 = vld [vmem:[%s1592_s1 + $0xa8] sm:$0xff] }
  0x22   :  { %913 = vmatprep.subr.bf16.mxu1 %v1038_v0  ;;  %v766_v28 = vld [vmem:[%s1592_s1 + $0xa0] sm:$0xff]  ;;  %v800_v38 = vld [vmem:[%s1592_s1 + $0xf0] sm:$0xff]  ;;  %v843_v40 = vld [vmem:[%s1591_s2 + $0x2c8] sm:$0xff] }
  0x23   :  { %v798_v31 = vld [vmem:[%s1592_s1 + $0xe0] sm:$0xff]  ;;  %v827_v41 = vld [vmem:[%s1592_s1 + $0x108] sm:$0xff] }
  0x24   :  { %885 = vmatpush1.bf16.msra.mxu0 %v884_v55  ;;  %v815_v55 = vld [vmem:[%s1591_s2 + $0x248] sm:$0xff]  ;;  %v846_v47 = vld [vmem:[%s1591_s2 + $0x2e0] sm:$0xff] }
  0x25   :  { %915 = vmatpush1.bf16.msra.mxu1 %v914_v56  ;;  %886 = vmatprep.subr.bf16.mxu0 %v1038_v0  ;;  %v938_v56 = vpack.c.bf16 %v783_v53, %v782_v52  ;;  %v968_v57 = vpack.c.bf16 %v815_v55, %v814_v54  ;;  %v847_v48 = vld [vmem:[%s1591_s2 + $0x2e8] sm:$0xff]  ;;  %v850_v53 = vld [vmem:[%s1591_s2 + $0x300] sm:$0xff] }
  0x26   :  { %916 = vmatprep.subr.bf16.mxu1 %v1038_v0  ;;  %v998_v49 = vpack.c.bf16 %v847_v48, %v846_v47  ;;  %v851_v54 = vld [vmem:[%s1591_s2 + $0x308] sm:$0xff] }
  0x27   :  { %v1004_v55 = vpack.c.bf16 %v851_v54, %v850_v53 }
  0x28   :  { %888 = vmatpush1.bf16.msra.mxu0 %v887_v61  ;;  %v817_v61 = vld [vmem:[%s1591_s2 + $0x258] sm:$0xff] }
  0x29   :  { %918 = vmatpush1.bf16.msra.mxu1 %v917_v62  ;;  %919 = vmatprep.subr.bf16.mxu0 %v1038_v0  ;;  %v941_v62 = vpack.c.bf16 %v785_v59, %v784_v58  ;;  %v971_v63 = vpack.c.bf16 %v817_v61, %v816_v60  ;;  %v826_v59 = vld [vmem:[%s1592_s1 + $0x100] sm:$0xff]  ;;  %v829_v61 = vld [vmem:[%s1592_s1 + $0x118] sm:$0xff] }
  0x2a   :  { %949 = vmatprep.subr.bf16.mxu1 %v1038_v0  ;;  %v830_v60 = vld [vmem:[%s1592_s1 + $0x120] sm:$0xff] }
  0x2b   :  { %153 = vmatmul.mubr.f32.vlgmr.msra.gmra.mrb[0].mxu0 %v726_v4  ;;  %v819_v4 = vld [vmem:[%s1591_s2 + $0x268] sm:$0xff] }
  0x2c   :  { %250 = vmatmul.mubr.f32.vlgmr.msra.gmra.mrb[0].mxu1 %v17_v6  ;;  %921 = vmatpush1.bf16.msra.mxu0 %v920_v5  ;;  %v944_v5 = vpack.c.bf16 %v787_v2, %v786_v1  ;;  %v974_v6 = vpack.c.bf16 %v819_v4, %v818_v3 }
  0x2d   :  { %951 = vmatpush1.bf16.msra.mxu1 %v950_v7  ;;  %922 = vmatprep.subr.bf16.mxu0 %v1038_v0  ;;  %v788_v7 = vld [vmem:[%s1591_s2 + $0x1d0] sm:$0xff] }
  0x2e   :  { %952 = vmatprep.subr.bf16.mxu1 %v1038_v0  ;;  %755 = vmatprep.mubr.msk.f32.mxu0 %vm75_vm0, %v729_v12  ;;  %v947_v11 = vpack.c.bf16 %v789_v8, %v788_v7  ;;  %v977_v12 = vpack.c.bf16 %v821_v10, %v820_v9 }
  0x2f   :  { %759 = vmatprep.mubr.msk.f32.mxu1 %vm75_vm0, %v20_v14  ;;  %158 = vmatmul.mubr.f32.gmra.mrb[2].mxu0 %v728_v15  ;;  %v835_v14 = vld [vmem:[%s1591_s2 + $0x288] sm:$0xff]  ;;  %v762_v15 = vld [vmem:[%s1592_s1 + $0x80] sm:$0xff] }
  0x30   :  { %924 = vmatpush1.bf16.msra.mxu0 %v923_v13  ;;  %255 = vmatmul.mubr.f32.gmra.mrb[2].mxu1 %v19_v19  ;;  %v834_v13 = vld [vmem:[%s1591_s2 + $0x280] sm:$0xff]  ;;  %v837_v19 = vld [vmem:[%s1591_s2 + $0x298] sm:$0xff] }
  0x31   :  { %954 = vmatpush1.bf16.msra.mxu1 %v953_v16  ;;  %925 = vmatprep.subr.bf16.mxu0 %v1038_v0  ;;  %v980_v16 = vpack.c.bf16 %v835_v14, %v834_v13 }
  0x32   :  { %955 = vmatprep.subr.bf16.mxu1 %v1038_v0  ;;  %756 = vmatprep.mubr.msk.f32.mxu0 %vm75_vm0, %v731_v22  ;;  %v797_v22 = vld [vmem:[%s1592_s1 + $0xd8] sm:$0xff] }
  0x33   :  { %760 = vmatprep.mubr.msk.f32.mxu1 %vm75_vm0, %v22_v24  ;;  %163 = vmatmul.mubr.f32.gmra.mrb[4].mxu0 %v730_v25  ;;  %v796_v24 = vld [vmem:[%s1592_s1 + $0xd0] sm:$0xff]  ;;  %v838_v25 = vld [vmem:[%s1591_s2 + $0x2a0] sm:$0xff] }
  0x34   :  { %927 = vmatpush1.bf16.msra.mxu0 %v926_v23  ;;  %260 = vmatmul.mubr.f32.gmra.mrb[4].mxu1 %v21_v29  ;;  %v983_v23 = vpack.c.bf16 %v837_v19, %v836_v18  ;;  %v799_v29 = vld [vmem:[%s1592_s1 + $0xe8] sm:$0xff] }
  0x35   :  { %957 = vmatpush1.bf16.msra.mxu1 %v956_v26  ;;  %928 = vmatprep.subr.bf16.mxu0 %v1038_v0  ;;  %v839_v26 = vld [vmem:[%s1591_s2 + $0x2a8] sm:$0xff] }
  0x36   :  { %958 = vmatprep.subr.bf16.mxu1 %v1038_v0  ;;  %757 = vmatprep.mubr.msk.f32.mxu0 %vm75_vm0, %v733_v32  ;;  %v986_v30 = vpack.c.bf16 %v839_v26, %v838_v25  ;;  %v840_v32 = vld [vmem:[%s1591_s2 + $0x2b0] sm:$0xff] }
  0x37   :  { %761 = vmatprep.mubr.msk.f32.mxu1 %vm75_vm0, %v24_v34  ;;  %168 = vmatmul.mubr.f32.gmra.mrb[6].mxu0 %v732_v35  ;;  %v769_v34 = vld [vmem:[%s1592_s1 + $0xb8] sm:$0xff]  ;;  %v768_v35 = vld [vmem:[%s1592_s1 + $0xb0] sm:$0xff] }
  0x38   :  { %930 = vmatpush1.bf16.msra.mxu0 %v929_v33  ;;  %265 = vmatmul.mubr.f32.gmra.mrb[6].mxu1 %v23_v39  ;;  %v841_v33 = vld [vmem:[%s1591_s2 + $0x2b8] sm:$0xff]  ;;  %v842_v39 = vld [vmem:[%s1591_s2 + $0x2c0] sm:$0xff] }
  0x39   :  { %960 = vmatpush1.bf16.msra.mxu1 %v959_v36  ;;  %931 = vmatprep.subr.bf16.mxu0 %v1038_v0  ;;  %v801_v36 = vld [vmem:[%s1592_s1 + $0xf8] sm:$0xff]  ;;  %v989_v37 = vpack.c.bf16 %v841_v33, %v840_v32 }
  0x3a   :  { %961 = vmatprep.subr.bf16.mxu1 %v1038_v0  ;;  %790 = vmatprep.mubr.msk.f32.mxu0 %vm75_vm0, %v763_v42  ;;  %v992_v42 = vpack.c.bf16 %v843_v40, %v842_v39 }
  0x3b   :  { %822 = vmatprep.mubr.msk.f32.mxu1 %vm75_vm0, %v795_v44  ;;  %v844_v44 = vld [vmem:[%s1591_s2 + $0x2d0] sm:$0xff] }
  0x3c   :  { %933 = vmatpush1.bf16.msra.mxu0 %v932_v43  ;;  %v831_v43 = vld [vmem:[%s1592_s1 + $0x128] sm:$0xff] }
  0x3d   :  { %963 = vmatpush1.bf16.msra.mxu1 %v962_v45  ;;  %934 = vmatprep.subr.bf16.mxu0 %v1038_v0  ;;  %v845_v45 = vld [vmem:[%s1591_s2 + $0x2d8] sm:$0xff] }
  0x3e   :  { %964 = vmatprep.subr.bf16.mxu1 %v1038_v0  ;;  %v995_v46 = vpack.c.bf16 %v845_v45, %v844_v44 }
  0x40   :  { %936 = vmatpush1.bf16.msra.mxu0 %v935_v50  ;;  %v848_v50 = vld [vmem:[%s1591_s2 + $0x2f0] sm:$0xff] }
  0x41   :  { %966 = vmatpush1.bf16.msra.mxu1 %v965_v51  ;;  %937 = vmatprep.subr.bf16.mxu0 %v1038_v0  ;;  %v849_v51 = vld [vmem:[%s1591_s2 + $0x2f8] sm:$0xff] }
  0x42   :  { %967 = vmatprep.subr.bf16.mxu1 %v1038_v0  ;;  %v1001_v52 = vpack.c.bf16 %v849_v51, %v848_v50 }
  0x44   :  { %939 = vmatpush1.bf16.msra.mxu0 %v938_v56  ;;  %v852_v56 = vld [vmem:[%s1591_s2 + $0x310] sm:$0xff] }
  0x45   :  { %969 = vmatpush1.bf16.msra.mxu1 %v968_v57  ;;  %940 = vmatprep.subr.bf16.mxu0 %v1038_v0  ;;  %v853_v57 = vld [vmem:[%s1591_s2 + $0x318] sm:$0xff] }
  0x46   :  { %970 = vmatprep.subr.bf16.mxu1 %v1038_v0  ;;  %v1007_v58 = vpack.c.bf16 %v853_v57, %v852_v56 }
  0x48   :  { %942 = vmatpush1.bf16.msra.mxu0 %v941_v62  ;;  %v833_v62 = vld [vmem:[%s1592_s1 + $0x138] sm:$0xff] }
  0x49   :  { %972 = vmatpush1.bf16.msra.mxu1 %v971_v63  ;;  %943 = vmatprep.subr.bf16.mxu0 %v1038_v0  ;;  %v832_v63 = vld [vmem:[%s1592_s1 + $0x130] sm:$0xff] }
  0x4a   :  { %973 = vmatprep.subr.bf16.mxu1 %v1038_v0 }
  0x4c   :  { %945 = vmatpush1.bf16.msra.mxu0 %v944_v5 }
  0x4d   :  { %975 = vmatpush1.bf16.msra.mxu1 %v974_v6  ;;  %946 = vmatprep.subr.bf16.mxu0 %v1038_v0 }
  0x4e   :  { %976 = vmatprep.subr.bf16.mxu1 %v1038_v0 }
  0x50   :  { %948 = vmatpush1.bf16.msra.mxu0 %v947_v11 }
  0x51   :  { %978 = vmatpush1.bf16.msra.mxu1 %v977_v12  ;;  %979 = vmatprep.subr.bf16.mxu0 %v1038_v0 }
  0x52   :  { %1009 = vmatprep.subr.bf16.mxu1 %v1038_v0 }
  0x53   :  { %377 = vmatmul.mubr.f32.vlgmr.msra.gmra.mrb[8].mxu0 %v762_v15 }
  0x54   :  { %508 = vmatmul.mubr.f32.vlgmr.msra.gmra.mrb[8].mxu1 %v794_v17  ;;  %981 = vmatpush1.bf16.msra.mxu0 %v980_v16 }
  0x55   :  { %1019 = vmatpush1.bf16.msra.mxu1 %v980_v16  ;;  %791 = vmatprep.mubr.msk.f32.mxu0 %vm75_vm0, %v765_v20 }
  0x56   :  { %982 = vmatprep.subr.bf16.mxu0 %v1038_v0  ;;  %1010 = vmatprep.subr.bf16.mxu1 %v1038_v0 }
  0x57   :  { %382 = vmatmul.mubr.f32.gmra.mrb[10].mxu0 %v764_v21  ;;  %823 = vmatprep.mubr.msk.f32.mxu1 %vm75_vm0, %v797_v22 }
  0x58   :  { %984 = vmatpush1.bf16.msra.mxu0 %v983_v23  ;;  %513 = vmatmul.mubr.f32.gmra.mrb[10].mxu1 %v796_v24 }
  0x59   :  { %1020 = vmatpush1.bf16.msra.mxu1 %v983_v23  ;;  %792 = vmatprep.mubr.msk.f32.mxu0 %vm75_vm0, %v767_v27 }
  0x5a   :  { %985 = vmatprep.subr.bf16.mxu0 %v1038_v0  ;;  %1011 = vmatprep.subr.bf16.mxu1 %v1038_v0 }
  0x5b   :  { %387 = vmatmul.mubr.f32.gmra.mrb[12].mxu0 %v766_v28  ;;  %824 = vmatprep.mubr.msk.f32.mxu1 %vm75_vm0, %v799_v29 }
  0x5c   :  { %987 = vmatpush1.bf16.msra.mxu0 %v986_v30  ;;  %518 = vmatmul.mubr.f32.gmra.mrb[12].mxu1 %v798_v31 }
  0x5d   :  { %1021 = vmatpush1.bf16.msra.mxu1 %v986_v30  ;;  %793 = vmatprep.mubr.msk.f32.mxu0 %vm75_vm0, %v769_v34 }
  0x5e   :  { %988 = vmatprep.subr.bf16.mxu0 %v1038_v0  ;;  %1012 = vmatprep.subr.bf16.mxu1 %v1038_v0 }
  0x5f   :  { %392 = vmatmul.mubr.f32.gmra.mrb[14].mxu0 %v768_v35  ;;  %825 = vmatprep.mubr.msk.f32.mxu1 %vm75_vm0, %v801_v36 }
  0x60   :  { %990 = vmatpush1.bf16.msra.mxu0 %v989_v37  ;;  %523 = vmatmul.mubr.f32.gmra.mrb[14].mxu1 %v800_v38 }
  0x61   :  { %1022 = vmatpush1.bf16.msra.mxu1 %v989_v37  ;;  %991 = vmatprep.subr.bf16.mxu0 %v1038_v0 }
  0x62   :  { %1013 = vmatprep.subr.bf16.mxu1 %v1038_v0  ;;  %854 = vmatprep.mubr.msk.f32.mxu0 %vm75_vm0, %v827_v41 }
  0x63   :  { %856 = vmatprep.mubr.msk.f32.mxu1 %vm75_vm0, %v831_v43 }
  0x64   :  { %993 = vmatpush1.bf16.msra.mxu0 %v992_v42 }
  0x65   :  { %1023 = vmatpush1.bf16.msra.mxu1 %v992_v42  ;;  %994 = vmatprep.subr.bf16.mxu0 %v1038_v0 }
  0x66   :  { %1014 = vmatprep.subr.bf16.mxu1 %v1038_v0 }
  0x68   :  { %996 = vmatpush1.bf16.msra.mxu0 %v995_v46 }
  0x69   :  { %1024 = vmatpush1.bf16.msra.mxu1 %v995_v46  ;;  %997 = vmatprep.subr.bf16.mxu0 %v1038_v0  ;;  %v858_v46 = vld [vmem:[%s1593_s3] ss:$0 sm:$0xff] }
  0x6a   :  { %1015 = vmatprep.subr.bf16.mxu1 %v1038_v0 }
  0x6c   :  { %999 = vmatpush1.bf16.msra.mxu0 %v998_v49 }
  0x6d   :  { %1025 = vmatpush1.bf16.msra.mxu1 %v998_v49  ;;  %1000 = vmatprep.subr.bf16.mxu0 %v1038_v0 }
  0x6e   :  { %1016 = vmatprep.subr.bf16.mxu1 %v1038_v0 }
  0x70   :  { %1002 = vmatpush1.bf16.msra.mxu0 %v1001_v52 }
  0x71   :  { %1026 = vmatpush1.bf16.msra.mxu1 %v1001_v52  ;;  %1003 = vmatprep.subr.bf16.mxu0 %v1038_v0 }
  0x72   :  { %1017 = vmatprep.subr.bf16.mxu1 %v1038_v0 }
  0x74   :  { %1005 = vmatpush1.bf16.msra.mxu0 %v1004_v55 }
  0x75   :  { %1027 = vmatpush1.bf16.msra.mxu1 %v1004_v55  ;;  %1006 = vmatprep.subr.bf16.mxu0 %v1038_v0 }
  0x76   :  { %1018 = vmatprep.subr.bf16.mxu1 %v1038_v0  ;;  %v828_v0 = vld [vmem:[%s1592_s1 + $0x110] sm:$0xff] }
  0x78   :  { %1008 = vmatpush1.bf16.msra.mxu0 %v1007_v58 }
  0x79   :  { %1028 = vmatpush1.bf16.msra.mxu1 %v1007_v58 }
  0x7b   :  { %639 = vmatmul.mubr.f32.vlgmr.msra.gmra.mrb[16].mxu0 %v826_v59 }
  0x7c   :  { %649 = vmatmul.mubr.f32.vlgmr.msra.gmra.mrb[16].mxu1 %v830_v60  ;;  %855 = vmatprep.mubr.msk.f32.mxu0 %vm75_vm0, %v829_v61 }
  0x7d   :  { %857 = vmatprep.mubr.msk.f32.mxu1 %vm75_vm0, %v833_v62 }
  0x7f   :  { %644 = vmatmul.mubr.f32.gmra.mrb[18].mxu0 %v828_v0 }
  0x80   :  { %654 = vmatmul.mubr.f32.gmra.mrb[18].mxu1 %v832_v63 }
  0xfe   :  { %v154_v1 = vpop.f32.mrb[0].mxu0 }
  0xff   :  { %v251_v2 = vpop.f32.mrb[0].mxu1  ;;  %v156_v3 = vpop.f32.mrb[1].mxu0 }
 0x100   :  { %v252_v4 = vadd.f32 %v251_v2, %v154_v1  ;;  %v253_v5 = vpop.f32.mrb[1].mxu1 }
 0x102   :  { %v159_v6 = vpop.f32.mrb[2].mxu0 }
 0x103   :  { %v256_v7 = vpop.f32.mrb[2].mxu1  ;;  %v161_v8 = vpop.f32.mrb[3].mxu0 }
 0x104   :  { %v257_v9 = vadd.f32 %v256_v7, %v159_v6  ;;  %v258_v10 = vpop.f32.mrb[3].mxu1 }
 0x106   :  { %v164_v11 = vpop.f32.mrb[4].mxu0 }
 0x107   :  { %v261_v12 = vpop.f32.mrb[4].mxu1  ;;  %v166_v13 = vpop.f32.mrb[5].mxu0 }
 0x108   :  { %v262_v14 = vadd.f32 %v261_v12, %v164_v11  ;;  %v263_v15 = vpop.f32.mrb[5].mxu1 }
 0x10a   :  { %v169_v16 = vpop.f32.mrb[6].mxu0 }
 0x10b   :  { %v266_v17 = vpop.f32.mrb[6].mxu1  ;;  %v171_v18 = vpop.f32.mrb[7].mxu0 }
 0x10c   :  { %v267_v19 = vadd.f32 %v266_v17, %v169_v16  ;;  %v268_v20 = vpop.f32.mrb[7].mxu1 }
 0x126   :  { %v378_v21 = vpop.f32.mrb[8].mxu0 }
 0x127   :  { %v397_v22 = vadd.f32 %v378_v21, %v252_v4  ;;  %v509_v23 = vpop.f32.mrb[8].mxu1  ;;  %v380_v24 = vpop.f32.mrb[9].mxu0 }
 0x128   :  { %v511_v25 = vpop.f32.mrb[9].mxu1 }
 0x129   :  { %v528_v26 = vadd.f32 %v509_v23, %v397_v22  ;;  %v710_v22 = vld [vmem:[%s1594_s0] sm:$0xff] }
 0x12a   :  { %v383_v27 = vpop.f32.mrb[10].mxu0 }
 0x12b   :  { %v398_v28 = vadd.f32 %v383_v27, %v257_v9  ;;  %v514_v29 = vpop.f32.mrb[10].mxu1  ;;  %v385_v30 = vpop.f32.mrb[11].mxu0 }
 0x12c   :  { %v516_v31 = vpop.f32.mrb[11].mxu1 }
 0x12d   :  { %v529_v32 = vadd.f32 %v514_v29, %v398_v28 }
 0x12e   :  { %v388_v33 = vpop.f32.mrb[12].mxu0 }
 0x12f   :  { %v399_v34 = vadd.f32 %v388_v33, %v262_v14  ;;  %v519_v35 = vpop.f32.mrb[12].mxu1  ;;  %v390_v36 = vpop.f32.mrb[13].mxu0 }
 0x130   :  { %v521_v37 = vpop.f32.mrb[13].mxu1 }
 0x131   :  { %v530_v38 = vadd.f32 %v519_v35, %v399_v34  ;;  %v711_v34 = vld [vmem:[%s1594_s0 + $0x8] sm:$0xff] }
 0x132   :  { %v393_v39 = vpop.f32.mrb[14].mxu0 }
 0x133   :  { %v400_v40 = vadd.f32 %v393_v39, %v267_v19  ;;  %v524_v41 = vpop.f32.mrb[14].mxu1  ;;  %v395_v42 = vpop.f32.mrb[15].mxu0 }
 0x134   :  { %v526_v43 = vpop.f32.mrb[15].mxu1 }
 0x135   :  { %v531_v44 = vadd.f32 %v524_v41, %v400_v40 }
 0x14e   :  { %v640_v45 = vpop.f32.mrb[16].mxu0 }
 0x14f   :  { %v659_v47 = vadd.f32 %v640_v45, %v528_v26  ;;  %v650_v48 = vpop.f32.mrb[16].mxu1  ;;  %v642_v49 = vpop.f32.mrb[17].mxu0  ;;  %v712_v26 = vld [vmem:[%s1594_s0 + $0x10] sm:$0xff] }
 0x150   :  { %v661_v50 = vadd.f32 %v650_v48, %v530_v38  ;;  %v652_v51 = vpop.f32.mrb[17].mxu1  ;;  %v713_v38 = vld [vmem:[%s1594_s0 + $0x18] sm:$0xff] }
 0x151   :  { %v670_v52 = vadd.f32 %v858_v46, %v659_v47 }
 0x152   :  { %v672_v53 = vadd.f32 %v858_v46, %v661_v50  ;;  %v645_v54 = vpop.f32.mrb[18].mxu0 }
 0x153   :  { %v678_v55 = vmul.f32 0.044715, %v670_v52  ;;  %v660_v56 = vadd.f32 %v645_v54, %v529_v32  ;;  %v655_v57 = vpop.f32.mrb[18].mxu1  ;;  %v647_v58 = vpop.f32.mrb[19].mxu0  ;;  %v674_v20 = vmul.f32 0.5, %v670_v52 }
 0x154   :  { %v680_v59 = vmul.f32 0.044715, %v672_v53  ;;  %v662_v60 = vadd.f32 %v655_v57, %v531_v44  ;;  %v657_v61 = vpop.f32.mrb[19].mxu1  ;;  %v676_v23 = vmul.f32 0.5, %v672_v53 }
 0x155   :  { %v682_v62 = vmul.f32 %v678_v55, %v670_v52  ;;  %v671_v0 = vadd.f32 %v858_v46, %v660_v56 }
 0x156   :  { %v684_v63 = vmul.f32 %v680_v59, %v672_v53  ;;  %v673_v1 = vadd.f32 %v858_v46, %v662_v60 }
 0x157   :  { %v686_v2 = vmul.f32 %v682_v62, %v670_v52  ;;  %v679_v3 = vmul.f32 0.044715, %v671_v0  ;;  %v675_v31 = vmul.f32 0.5, %v671_v0 }
 0x158   :  { %v688_v4 = vmul.f32 %v684_v63, %v672_v53  ;;  %v681_v5 = vmul.f32 0.044715, %v673_v1  ;;  %v677_v35 = vmul.f32 0.5, %v673_v1 }
 0x159   :  { %v690_v6 = vadd.f32 %v686_v2, %v670_v52  ;;  %v683_v7 = vmul.f32 %v679_v3, %v671_v0 }
 0x15a   :  { %v692_v8 = vadd.f32 %v688_v4, %v672_v53  ;;  %v685_v9 = vmul.f32 %v681_v5, %v673_v1 }
 0x15b   :  { %v694_v10 = vmul.f32 0.7978846, %v690_v6  ;;  %v687_v11 = vmul.f32 %v683_v7, %v671_v0 }
 0x15c   :  { %v696_v12 = vmul.f32 0.7978846, %v692_v8  ;;  %v689_v13 = vmul.f32 %v685_v9, %v673_v1 }
 0x15d   :  { %1030 = vtanh.f32 %v694_v10  ;;  %v691_v14 = vadd.f32 %v687_v11, %v671_v0 }
 0x15e   :  { %1032 = vtanh.f32 %v696_v12  ;;  %v693_v15 = vadd.f32 %v689_v13, %v673_v1 }
 0x15f   :  { %v695_v16 = vmul.f32 0.7978846, %v691_v14 }
 0x160   :  { %v697_v17 = vmul.f32 0.7978846, %v693_v15 }
 0x161   :  { %1034 = vtanh.f32 %v695_v16 }
 0x162   :  { %1036 = vtanh.f32 %v697_v17 }
 0x167   :  { %v1031_v18 = vpop.eup %1030 }
 0x168   :  { %v1033_v19 = vpop.eup %1032  ;;  %v702_v21 = vadd.f32 1.0, %v1031_v18 }
 0x169   :  { %v704_v24 = vadd.f32 1.0, %v1033_v19 }
 0x16a   :  { %v706_v25 = vmul.f32 %v702_v21, %v674_v20 }
 0x16b   :  { %v1035_v27 = vpop.eup %1034  ;;  %v708_v28 = vmul.f32 %v704_v24, %v676_v23 }
 0x16c   :  { %v1037_v29 = vpop.eup %1036  ;;  %v714_v30 = vadd.f32 %v710_v22, %v706_v25  ;;  %v703_v32 = vadd.f32 1.0, %v1035_v27 }
 0x16d   :  { %v716_v33 = vadd.f32 %v712_v26, %v708_v28  ;;  %v705_v36 = vadd.f32 1.0, %v1037_v29 }
 0x16e   :  { %718 = vst [vmem:[%s1595_s4] sm:$0xff] %v714_v30  ;;  %v707_v37 = vmul.f32 %v703_v32, %v675_v31 }
 0x16f   :  { %720 = vst [vmem:[%s1595_s4 + $0x10] sm:$0xff] %v716_v33  ;;  %v709_v39 = vmul.f32 %v705_v36, %v677_v35 }
 0x170   :  { %v715_v40 = vadd.f32 %v711_v34, %v707_v37 }
 0x171   :  { %v717_v41 = vadd.f32 %v713_v38, %v709_v39 }
 0x172   :  { %719 = vst [vmem:[%s1595_s4 + $0x8] sm:$0xff] %v715_v40 }
 0x173   :  { %721 = vst [vmem:[%s1595_s4 + $0x18] sm:$0xff] %v717_v41 }

</bundles_post_ra>
